<compile_context>
chip_gen: v7x
topology: tpu7x:2x2x1
jax: 0.10.0
libtpu: 0.0.40
codegen_flags: <defaults>
</compile_context>

<pallas_src>
import jax
import jax.numpy as jnp
import numpy as np
from jax import lax
from jax.experimental import pallas as pl
from jax.experimental.pallas import tpu as pltpu


def _round_up(v, m):
    return ((v + m - 1) // m) * m


# ----------------------------------------------------------------------------
# Pallas kernel: one block of destination nodes.
#   base  = x_dst @ W1_top + b1                          (once per block)
#   per slot-chunk c (8 slots, batched as one tall matmul):
#     h = relu(diff @ W1_bot + base) ; y = h @ W2        (MXU, bf16 in / f32 acc)
#     y = slot < in_deg ? y : -inf ; red = max(red, max_slots(y))
#   out = red > -inf ? red + b2 : 0                      (scatter_max 0-fill)
# ----------------------------------------------------------------------------
def _edgeconv_kernel(deg_ref,            # VMEM (n_blk, 1)   int32 in-degree
                     x_ref,              # VMEM (n_blk, C)   bf16  x[dst]
                     diff_ref,           # VMEM (deg_pad, n_blk, C) bf16 (x_j - x_i)
                     w1t_ref, w1b_ref,   # VMEM (C, H8) bf16 each
                     b1_ref,             # VMEM (1, H8) f32
                     w2_ref,             # VMEM (H8, Hout) bf16
                     b2_ref,             # VMEM (1, Hout) f32
                     out_ref):           # VMEM (n_blk, Hout) f32
    deg_pad, n_blk, _ = diff_ref.shape
    h_out = out_ref.shape[-1]
    slot_chunk = min(8, deg_pad)
    n_chunks = deg_pad // slot_chunk

    # x_i contribution through the first Linear, shared by every neighbor slot.
    base = jnp.dot(x_ref[...], w1t_ref[...],
                   preferred_element_type=jnp.float32) + b1_ref[...]   # (n_blk, H8)
    # Hoist broadcasts out of the slot loop (JAX does not CSE broadcast_in_dim).
    base3 = jnp.broadcast_to(base[None, :, :],
                             (slot_chunk, n_blk, base.shape[-1]))
    deg = deg_ref[...]                                                  # (n_blk, 1)
    w1b = w1b_ref[...]
    w2 = w2_ref[...]
    neg_inf = jnp.float32(-jnp.inf)

    def chunk_body(c, red):
        start = pl.multiple_of(c * slot_chunk, slot_chunk)
        d = diff_ref[pl.ds(start, slot_chunk)]            # (chunk, n_blk, C) bf16
        d2 = d.reshape(slot_chunk * n_blk, d.shape[-1])
        # Tall matmul 1: (chunk*n_blk, C) @ (C, H8), f32 accumulation.
        h = jnp.dot(d2, w1b, preferred_element_type=jnp.float32)
        h = h.reshape(slot_chunk, n_blk, -1) + base3
        h = jnp.maximum(h, 0.0).astype(w2.dtype)          # ReLU, bf16 for MXU
        # Tall matmul 2: (chunk*n_blk, H8) @ (H8, Hout).
        y = jnp.dot(h.reshape(slot_chunk * n_blk, -1), w2,
                    preferred_element_type=jnp.float32)
        y = y.reshape(slot_chunk, n_blk, h_out)
        # Prefix-structured validity: slot j valid iff j < in_deg[node].
        slot = (lax.broadcasted_iota(jnp.int32, (slot_chunk, n_blk, 1), 0)
                + c * slot_chunk)
        y = jnp.where(slot < deg[None, :, :], y, neg_inf)
        return jnp.maximum(red, jnp.max(y, axis=0))

    red = lax.fori_loop(0, n_chunks, chunk_body,
                        jnp.full((n_blk, h_out), neg_inf, jnp.float32),
                        unroll=True)

    # b2 is constant across slots -> add once after the max; nodes that received
    # no edge get 0 (torch_scatter.scatter_max fill value).
    out_ref[...] = jnp.where(red > neg_inf, red + b2_ref[...],
                             0.0).astype(out_ref.dtype)


# ----------------------------------------------------------------------------
# Wrapper: kNN graph + destination-bucketed (x_j - x_i) slot table (glue)
#          -> Pallas kernel.
# ----------------------------------------------------------------------------
def edgeconv_pallas(x, pos, params, *, k, n_blk=256):
    N, C = x.shape
    H = params["w2"].shape[1]
    E = N * k
    assert n_blk % 8 == 0

    # --- glue: torch_cluster.knn_graph(pos, k, loop=False) equivalent --------
    # TODO(synk): top-k kNN graph construction has no clean Pallas equivalent;
    # it stays in plain JAX (pairwise distances + lax.top_k).
    d2 = jnp.sum((pos[:, None, :] - pos[None, :, :]) ** 2, axis=-1)
    d2 = jnp.where(jnp.eye(N, dtype=bool), jnp.inf, d2)            # loop=False
    _, nbr = lax.top_k(-d2, k)                                     # (N, k)
    # torch_cluster convention: edge_index[0] = neighbor (scatter destination),
    #                           edge_index[1] = center.
    nbr_flat = nbr.reshape(-1).astype(jnp.int32)                   # edge_index[0]
    ctr_flat = jnp.repeat(jnp.arange(N, dtype=jnp.int32), k)       # edge_index[1]

    # --- glue: bucket (x_j - x_i) by destination into a padded slot table ----
    # TODO(synk): the gather/sort/scatter bucketing has no robust vectorized
    # in-kernel equivalent on Mosaic; it stays as plain JAX glue.
    diff_e = x[ctr_flat] - x[nbr_flat]                             # (E, C)
    in_deg = jnp.zeros((N,), jnp.int32).at[nbr_flat].add(1)
    order = jnp.argsort(nbr_flat)                                  # group by destination
    dst_s = nbr_flat[order]
    diff_s = diff_e[order]
    seg_start = jnp.cumsum(in_deg) - in_deg
    rank = jnp.arange(E, dtype=jnp.int32) - seg_start[dst_s]       # slot within node

    # Concrete max reverse in-degree (wrapper is not jitted).  For a jitted
    # production path, replace with a static degree cap + tiny overflow pass.
    max_deg = int(jnp.max(in_deg))
    deg_pad = max(8, _round_up(max_deg, 8))

    n_pad = _round_up(N, n_blk)
    h8 = _round_up(H, 8)            # hidden width: sublane-multiple only
    h_out = _round_up(H, 128)       # final output width: lane-dense stores

    diff_tab = (jnp.zeros((deg_pad, n_pad, C), jnp.float32)
                .at[rank, dst_s].set(diff_s)).astype(jnp.bfloat16)
    x_pad = jnp.zeros((n_pad, C), jnp.float32).at[:N].set(x).astype(jnp.bfloat16)
    deg_vec = jnp.zeros((n_pad, 1), jnp.int32).at[:N, 0].set(in_deg)

    # MLP weights: W1 split into the x_i block (rows :C) and the (x_j - x_i)
    # block (rows C:); only the FINAL output axis is padded to 128 lanes.
    w1 = params["w1"].astype(jnp.float32)
    w1t = (jnp.zeros((C, h8), jnp.float32).at[:, :H].set(w1[:C])
           ).astype(jnp.bfloat16)
    w1b = (jnp.zeros((C, h8), jnp.float32).at[:, :H].set(w1[C:])
           ).astype(jnp.bfloat16)
    b1p = jnp.zeros((1, h8), jnp.float32).at[:, :H].set(params["b1"])
    w2p = (jnp.zeros((h8, h_out), jnp.float32).at[:H, :H].set(params["w2"])
           ).astype(jnp.bfloat16)
    b2p = jnp.zeros((1, h_out), jnp.float32).at[:, :H].set(params["b2"])

    grid = (n_pad // n_blk,)
    out = pl.pallas_call(
        _edgeconv_kernel,
        out_shape=jax.ShapeDtypeStruct((n_pad, h_out), x.dtype),
        grid=grid,
        in_specs=[
            pl.BlockSpec((n_blk, 1), lambda i: (i, 0)),                 # in-degree
            pl.BlockSpec((n_blk, C), lambda i: (i, 0)),                 # x[dst]
            pl.BlockSpec((deg_pad, n_blk, C), lambda i: (0, i, 0)),     # x_j - x_i
            pl.BlockSpec((C, h8), lambda i: (0, 0)),                    # W1 top
            pl.BlockSpec((C, h8), lambda i: (0, 0)),                    # W1 bottom
            pl.BlockSpec((1, h8), lambda i: (0, 0)),                    # b1
            pl.BlockSpec((h8, h_out), lambda i: (0, 0)),                # W2
            pl.BlockSpec((1, h_out), lambda i: (0, 0)),                 # b2
        ],
        out_specs=pl.BlockSpec((n_blk, h_out), lambda i: (i, 0)),
        compiler_params=pltpu.CompilerParams(
            dimension_semantics=("parallel",),      # node blocks are independent
            vmem_limit_bytes=32 * 1024 * 1024),
    )(deg_vec, x_pad, diff_tab, w1t, w1b, b1p, w2p, b2p)

    return out[:N, :H]


# ----------------------------------------------------------------------------
# Pure-JAX reference (mirrors the PyTorch forward exactly, in f32).
# ----------------------------------------------------------------------------
def edgeconv_reference(x, pos, params, *, k):
    N, _ = x.shape
    d2 = jnp.sum((pos[:, None, :] - pos[None, :, :]) ** 2, axis=-1)
    d2 = jnp.where(jnp.eye(N, dtype=bool), jnp.inf, d2)
    _, nbr = lax.top_k(-d2, k)
    nbr_flat = nbr.reshape(-1)
    ctr_flat = jnp.repeat(jnp.arange(N), k)
    x_i = x[nbr_flat]
    x_j = x[ctr_flat]
    feat = jnp.concatenate([x_i, x_j - x_i], axis=1)
    h = jnp.maximum(feat @ params["w1"] + params["b1"], 0.0)
    y = h @ params["w2"] + params["b2"]
    seg = jax.ops.segment_max(y, nbr_flat, num_segments=N)
    return jnp.where(jnp.isneginf(seg), 0.0, seg)


def init_params(key, in_dim, out_dim):
    k1, k2, k3, k4 = jax.random.split(key, 4)
    fan1 = 2 * in_dim
    lim1 = 1.0 / np.sqrt(fan1)
    lim2 = 1.0 / np.sqrt(out_dim)
    return dict(
        w1=jax.random.uniform(k1, (fan1, out_dim), jnp.float32, -lim1, lim1),
        b1=jax.random.uniform(k2, (1, out_dim), jnp.float32, -lim1, lim1),
        w2=jax.random.uniform(k3, (out_dim, out_dim), jnp.float32, -lim2, lim2),
        b2=jax.random.uniform(k4, (1, out_dim), jnp.float32, -lim2, lim2),
    )


if __name__ == "__main__":
    N, C, H, K = 64, 4, 32, 8      # points, in_dim, out_dim, k neighbors
    key = jax.random.PRNGKey(0)
    kx, kp, kw = jax.random.split(key, 3)
    x = jax.random.normal(kx, (N, C), dtype=jnp.float32)
    pos = jax.random.normal(kp, (N, 3), dtype=jnp.float32)
    params = init_params(kw, C, H)

    # n_blk=32 -> a 2-block grid (keeps both v7x TensorCores busy even at toy N).
    out = edgeconv_pallas(x, pos, params, k=K, n_blk=32)
    out = jax.block_until_ready(out)

    ref = edgeconv_reference(x, pos, params, k=K)
    # bf16 MXU inputs with f32 accumulation -> relaxed tolerance vs f32 reference.
    np.testing.assert_allclose(np.asarray(out), np.asarray(ref),
                               rtol=2e-2, atol=2e-2)
    print("KERNEL_OK")
</pallas_src>

<mosaic_0001>
module attributes {stable_mosaic.version = 11 : i64} {
  func.func @_edgeconv_kernel(%arg0: i32, %arg1: memref<32x1xi32, #tpu.memory_space<vmem>>, %arg2: memref<32x4xbf16, #tpu.memory_space<vmem>>, %arg3: memref<16x32x4xbf16, #tpu.memory_space<vmem>>, %arg4: memref<4x32xbf16, #tpu.memory_space<vmem>>, %arg5: memref<4x32xbf16, #tpu.memory_space<vmem>>, %arg6: memref<1x32xf32, #tpu.memory_space<vmem>>, %arg7: memref<32x128xbf16, #tpu.memory_space<vmem>>, %arg8: memref<1x128xf32, #tpu.memory_space<vmem>>, %arg9: memref<32x128xf32, #tpu.memory_space<vmem>>) attributes {dimension_semantics = [#tpu.dimension_semantics<parallel>], iteration_bounds = array<i64: 2>, scalar_prefetch = 0 : i64, scratch_operands = 0 : i64, tpu.core_type = #tpu.core_type<tc>, window_params = [{transform_indices = @transform_0, window_bounds = array<i64: 32, 1>}, {transform_indices = @transform_1, window_bounds = array<i64: 32, 4>}, {transform_indices = @transform_2, window_bounds = array<i64: 16, 32, 4>}, {pipeline_mode = #tpu.pipeline_mode<synchronous>, transform_indices = @transform_3, window_bounds = array<i64: 4, 32>}, {pipeline_mode = #tpu.pipeline_mode<synchronous>, transform_indices = @transform_4, window_bounds = array<i64: 4, 32>}, {pipeline_mode = #tpu.pipeline_mode<synchronous>, transform_indices = @transform_5, window_bounds = array<i64: 1, 32>}, {pipeline_mode = #tpu.pipeline_mode<synchronous>, transform_indices = @transform_6, window_bounds = array<i64: 32, 128>}, {pipeline_mode = #tpu.pipeline_mode<synchronous>, transform_indices = @transform_7, window_bounds = array<i64: 1, 128>}, {transform_indices = @transform_8, window_bounds = array<i64: 32, 128>}]} {
    %c0 = arith.constant 0 : index
    %c0_0 = arith.constant 0 : index
    %0 = vector.load %arg2[%c0, %c0_0] : memref<32x4xbf16, #tpu.memory_space<vmem>>, vector<32x4xbf16>
    %c0_1 = arith.constant 0 : index
    %c0_2 = arith.constant 0 : index
    %1 = vector.load %arg4[%c0_1, %c0_2] : memref<4x32xbf16, #tpu.memory_space<vmem>>, vector<4x32xbf16>
    %cst = arith.constant dense<0.000000e+00> : vector<32x32xf32>
    %2 = tpu.matmul %0, %1, %cst {dimension_numbers = #tpu.dot_dimension_numbers<[1], [0], [0], [1], [0, 0, 1, 1], [], []>} : vector<32x4xbf16>, vector<4x32xbf16>, vector<32x32xf32> -> vector<32x32xf32>
    %c0_3 = arith.constant 0 : index
    %c0_4 = arith.constant 0 : index
    %3 = vector.load %arg6[%c0_3, %c0_4] : memref<1x32xf32, #tpu.memory_space<vmem>>, vector<1x32xf32>
    %4 = vector.broadcast %3 : vector<1x32xf32> to vector<32x32xf32>
    %5 = arith.addf %2, %4 : vector<32x32xf32>
    %6 = vector.shape_cast %5 : vector<32x32xf32> to vector<1x32x32xf32>
    %7 = vector.shape_cast %6 : vector<1x32x32xf32> to vector<1x32x32xf32>
    %8 = vector.broadcast %7 : vector<1x32x32xf32> to vector<8x32x32xf32>
    %c0_5 = arith.constant 0 : index
    %c0_6 = arith.constant 0 : index
    %9 = vector.load %arg1[%c0_5, %c0_6] : memref<32x1xi32, #tpu.memory_space<vmem>>, vector<32x1xi32>
    %c0_7 = arith.constant 0 : index
    %c0_8 = arith.constant 0 : index
    %10 = vector.load %arg5[%c0_7, %c0_8] : memref<4x32xbf16, #tpu.memory_space<vmem>>, vector<4x32xbf16>
    %c0_9 = arith.constant 0 : index
    %c0_10 = arith.constant 0 : index
    %11 = vector.load %arg7[%c0_9, %c0_10] : memref<32x128xbf16, #tpu.memory_space<vmem>>, vector<32x128xbf16>
    %cst_11 = arith.constant 0xFF800000 : f32
    %12 = vector.broadcast %cst_11 : f32 to vector<32x128xf32>
    %cst_12 = arith.constant 0xFF800000 : f32
    %c0_i32 = arith.constant 0 : i32
    %c8_i32 = arith.constant 8 : i32
    %13 = arith.muli %c0_i32, %c8_i32 : i32
    %14 = tpu.assume_multiple %13, 8 : i32
    %15 = arith.index_cast %14 : i32 to index
    %c0_13 = arith.constant 0 : index
    %c0_14 = arith.constant 0 : index
    %16 = vector.load %arg3[%15, %c0_13, %c0_14] : memref<16x32x4xbf16, #tpu.memory_space<vmem>>, vector<8x32x4xbf16>
    %17 = vector.shape_cast %16 : vector<8x32x4xbf16> to vector<256x4xbf16>
    %cst_15 = arith.constant dense<0.000000e+00> : vector<256x32xf32>
    %18 = tpu.matmul %17, %10, %cst_15 {dimension_numbers = #tpu.dot_dimension_numbers<[1], [0], [0], [1], [0, 0, 1, 1], [], []>} : vector<256x4xbf16>, vector<4x32xbf16>, vector<256x32xf32> -> vector<256x32xf32>
    %19 = vector.shape_cast %18 : vector<256x32xf32> to vector<8x32x32xf32>
    %20 = arith.addf %19, %8 : vector<8x32x32xf32>
    %cst_16 = arith.constant 0.000000e+00 : f32
    %21 = vector.broadcast %cst_16 : f32 to vector<8x32x32xf32>
    %22 = arith.maximumf %20, %21 : vector<8x32x32xf32>
    %23 = arith.truncf %22 : vector<8x32x32xf32> to vector<8x32x32xbf16>
    %24 = vector.shape_cast %23 : vector<8x32x32xbf16> to vector<256x32xbf16>
    %cst_17 = arith.constant dense<0.000000e+00> : vector<256x128xf32>
    %25 = tpu.matmul %24, %11, %cst_17 {dimension_numbers = #tpu.dot_dimension_numbers<[1], [0], [0], [1], [0, 0, 1, 1], [], []>} : vector<256x32xbf16>, vector<32x128xbf16>, vector<256x128xf32> -> vector<256x128xf32>
    %26 = vector.shape_cast %25 : vector<256x128xf32> to vector<8x32x128xf32>
    %27 = tpu.iota {dimensions = array<i32: 0>} : vector<8x32x1xi32>
    %c8_i32_18 = arith.constant 8 : i32
    %28 = arith.muli %c0_i32, %c8_i32_18 : i32
    %29 = vector.broadcast %28 : i32 to vector<8x32x1xi32>
    %30 = arith.addi %27, %29 : vector<8x32x1xi32>
    %31 = vector.shape_cast %9 : vector<32x1xi32> to vector<1x32x1xi32>
    %32 = vector.broadcast %31 : vector<1x32x1xi32> to vector<8x32x1xi32>
    %33 = arith.cmpi slt, %30, %32 : vector<8x32x1xi32>
    %34 = vector.shape_cast %33 : vector<8x32x1xi1> to vector<8x32x1xi1>
    %35 = vector.broadcast %34 : vector<8x32x1xi1> to vector<8x32x128xi1>
    %36 = vector.broadcast %cst_12 : f32 to vector<8x32x128xf32>
    %37 = arith.select %35, %26, %36 : vector<8x32x128xi1>, vector<8x32x128xf32>
    %cst_19 = arith.constant dense<0xFF800000> : vector<32x128xf32>
    %38 = vector.multi_reduction <maximumf>, %37, %cst_19 [0] : vector<8x32x128xf32> to vector<32x128xf32>
    %39 = arith.maximumf %12, %38 : vector<32x128xf32>
    %c1_i32 = arith.constant 1 : i32
    %c8_i32_20 = arith.constant 8 : i32
    %40 = arith.muli %c1_i32, %c8_i32_20 : i32
    %41 = tpu.assume_multiple %40, 8 : i32
    %42 = arith.index_cast %41 : i32 to index
    %c0_21 = arith.constant 0 : index
    %c0_22 = arith.constant 0 : index
    %43 = vector.load %arg3[%42, %c0_21, %c0_22] : memref<16x32x4xbf16, #tpu.memory_space<vmem>>, vector<8x32x4xbf16>
    %44 = vector.shape_cast %43 : vector<8x32x4xbf16> to vector<256x4xbf16>
    %cst_23 = arith.constant dense<0.000000e+00> : vector<256x32xf32>
    %45 = tpu.matmul %44, %10, %cst_23 {dimension_numbers = #tpu.dot_dimension_numbers<[1], [0], [0], [1], [0, 0, 1, 1], [], []>} : vector<256x4xbf16>, vector<4x32xbf16>, vector<256x32xf32> -> vector<256x32xf32>
    %46 = vector.shape_cast %45 : vector<256x32xf32> to vector<8x32x32xf32>
    %47 = arith.addf %46, %8 : vector<8x32x32xf32>
    %cst_24 = arith.constant 0.000000e+00 : f32
    %48 = vector.broadcast %cst_24 : f32 to vector<8x32x32xf32>
    %49 = arith.maximumf %47, %48 : vector<8x32x32xf32>
    %50 = arith.truncf %49 : vector<8x32x32xf32> to vector<8x32x32xbf16>
    %51 = vector.shape_cast %50 : vector<8x32x32xbf16> to vector<256x32xbf16>
    %cst_25 = arith.constant dense<0.000000e+00> : vector<256x128xf32>
    %52 = tpu.matmul %51, %11, %cst_25 {dimension_numbers = #tpu.dot_dimension_numbers<[1], [0], [0], [1], [0, 0, 1, 1], [], []>} : vector<256x32xbf16>, vector<32x128xbf16>, vector<256x128xf32> -> vector<256x128xf32>
    %53 = vector.shape_cast %52 : vector<256x128xf32> to vector<8x32x128xf32>
    %54 = tpu.iota {dimensions = array<i32: 0>} : vector<8x32x1xi32>
    %c8_i32_26 = arith.constant 8 : i32
    %55 = arith.muli %c1_i32, %c8_i32_26 : i32
    %56 = vector.broadcast %55 : i32 to vector<8x32x1xi32>
    %57 = arith.addi %54, %56 : vector<8x32x1xi32>
    %58 = vector.shape_cast %9 : vector<32x1xi32> to vector<1x32x1xi32>
    %59 = vector.broadcast %58 : vector<1x32x1xi32> to vector<8x32x1xi32>
    %60 = arith.cmpi slt, %57, %59 : vector<8x32x1xi32>
    %61 = vector.shape_cast %60 : vector<8x32x1xi1> to vector<8x32x1xi1>
    %62 = vector.broadcast %61 : vector<8x32x1xi1> to vector<8x32x128xi1>
    %63 = vector.broadcast %cst_12 : f32 to vector<8x32x128xf32>
    %64 = arith.select %62, %53, %63 : vector<8x32x128xi1>, vector<8x32x128xf32>
    %cst_27 = arith.constant dense<0xFF800000> : vector<32x128xf32>
    %65 = vector.multi_reduction <maximumf>, %64, %cst_27 [0] : vector<8x32x128xf32> to vector<32x128xf32>
    %66 = arith.maximumf %39, %65 : vector<32x128xf32>
    %c2_i32 = arith.constant 2 : i32
    %cst_28 = arith.constant 0xFF800000 : f32
    %67 = vector.broadcast %cst_28 : f32 to vector<32x128xf32>
    %68 = arith.cmpf ogt, %66, %67 : vector<32x128xf32>
    %c0_29 = arith.constant 0 : index
    %c0_30 = arith.constant 0 : index
    %69 = vector.load %arg8[%c0_29, %c0_30] : memref<1x128xf32, #tpu.memory_space<vmem>>, vector<1x128xf32>
    %70 = vector.broadcast %69 : vector<1x128xf32> to vector<32x128xf32>
    %71 = arith.addf %66, %70 : vector<32x128xf32>
    %cst_31 = arith.constant 0.000000e+00 : f32
    %72 = vector.broadcast %cst_31 : f32 to vector<32x128xf32>
    %73 = arith.select %68, %71, %72 : vector<32x128xi1>, vector<32x128xf32>
    %c0_32 = arith.constant 0 : index
    %c0_33 = arith.constant 0 : index
    %74 = vector.load %arg9[%c0_32, %c0_33] : memref<32x128xf32, #tpu.memory_space<vmem>>, vector<32x128xf32>
    tpu.vector_store %arg9[%c0_32, %c0_33], %73 {strides = array<i32>} : memref<32x128xf32, #tpu.memory_space<vmem>>, vector<32x128xf32>,
    return
  }
  func.func @transform_0(%arg0: i32) -> (i32, i32) {
    %c0_i32 = arith.constant 0 : i32
    %c0_i32_0 = arith.constant 0 : i32
    return %arg0, %c0_i32 : i32, i32
  }
  func.func @transform_1(%arg0: i32) -> (i32, i32) {
    %c0_i32 = arith.constant 0 : i32
    %c0_i32_0 = arith.constant 0 : i32
    return %arg0, %c0_i32 : i32, i32
  }
  func.func @transform_2(%arg0: i32) -> (i32, i32, i32) {
    %c0_i32 = arith.constant 0 : i32
    %c0_i32_0 = arith.constant 0 : i32
    %c0_i32_1 = arith.constant 0 : i32
    return %c0_i32, %arg0, %c0_i32_0 : i32, i32, i32
  }
  func.func @transform_3(%arg0: i32) -> (i32, i32) {
    %c0_i32 = arith.constant 0 : i32
    %c0_i32_0 = arith.constant 0 : i32
    %c0_i32_1 = arith.constant 0 : i32
    return %c0_i32, %c0_i32_0 : i32, i32
  }
  func.func @transform_4(%arg0: i32) -> (i32, i32) {
    %c0_i32 = arith.constant 0 : i32
    %c0_i32_0 = arith.constant 0 : i32
    %c0_i32_1 = arith.constant 0 : i32
    return %c0_i32, %c0_i32_0 : i32, i32
  }
  func.func @transform_5(%arg0: i32) -> (i32, i32) {
    %c0_i32 = arith.constant 0 : i32
    %c0_i32_0 = arith.constant 0 : i32
    %c0_i32_1 = arith.constant 0 : i32
    return %c0_i32, %c0_i32_0 : i32, i32
  }
  func.func @transform_6(%arg0: i32) -> (i32, i32) {
    %c0_i32 = arith.constant 0 : i32
    %c0_i32_0 = arith.constant 0 : i32
    %c0_i32_1 = arith.constant 0 : i32
    return %c0_i32, %c0_i32_0 : i32, i32
  }
  func.func @transform_7(%arg0: i32) -> (i32, i32) {
    %c0_i32 = arith.constant 0 : i32
    %c0_i32_0 = arith.constant 0 : i32
    %c0_i32_1 = arith.constant 0 : i32
    return %c0_i32, %c0_i32_0 : i32, i32
  }
  func.func @transform_8(%arg0: i32) -> (i32, i32) {
    %c0_i32 = arith.constant 0 : i32
    %c0_i32_0 = arith.constant 0 : i32
    return %arg0, %c0_i32 : i32, i32
  }
}

</mosaic_0001>

<bundles_post_ra>
// kernel: tpu_custom_call.1
= control target key start
LH: loop header
LB: loop body
LE: loop exit
PB: predicated region body
PF: predicated region fallthrough
CT: control target
= control target key end

     0   :  { %13 = vsyncpa [#allocation4], 0  ;;  %s3850_s0 = inlined_call_operand.vmem [shape: s32[64,1], index: 0, kind: input, shape index: {}]   ;;  %s3851_s1 = inlined_call_operand.vmem [shape: bf16[64,4], index: 1, kind: input, shape index: {}]   ;;  %s3852_s2 = inlined_call_operand.vmem [shape: bf16[16,64,4], index: 2, kind: input, shape index: {}]   ;;  %s3853_s3 = inlined_call_operand.vmem [shape: bf16[4,32], index: 3, kind: input, shape index: {}]   ;;  %s3854_s4 = inlined_call_operand.vmem [shape: bf16[4,32], index: 4, kind: input, shape index: {}]   ;;  %s3855_s5 = inlined_call_operand.vmem [shape: f32[1,32], index: 5, kind: input, shape index: {}]   ;;  %s3856_s6 = inlined_call_operand.vmem [shape: bf16[32,128], index: 6, kind: input, shape index: {}]   ;;  %s3857_s7 = inlined_call_operand.vmem [shape: f32[1,128], index: 7, kind: input, shape index: {}]   ;;  %s3858_s8 = inlined_call_operand.hbm [shape: f32[64,128], index: 8, kind: output, shape index: {}]  }
   0x1   :  { %15 = vsyncpa [#allocation4 + $0x1], 0  ;;  %s3187_s27 = smov 0   ;;  %s3189_s28 = smov 0  }
   0x2   :  { %s3191_s29 = smov 0   ;;  %s3193_s30 = smov 0  }
   0x3 LB: > { %s3208_s9 = sadd.s32 4294967295, %s3136_s30   ;;  %s2616_s10 = sadd.s32 4294967294, %s3136_s30   ;;  %s3136_s30 = sphi %s3193_s30, %s3864_s30   ;;  %s3132_s29 = sphi %s3191_s29, %s3863_s29   ;;  %s3128_s28 = sphi %s3189_s28, %s3862_s28   ;;  %s3124_s27 = sphi %s3187_s27, %s3861_s27  }
   0x4   : > { %s3212_s11 = sadd.s32 1, %s3136_s30   ;;  %s80_s12 = sadd.s32 1, %s3132_s29 }
   0x5   : > { %s77_s13 = ssub.s32 %s3136_s30, %s3212_s11  ;;  %p87_p0 = scmp.ne.s32.totalorder %s3132_s29, %s3128_s28 }
   0x6   : > { %p78_p1 = scmp.eq.s32.totalorder %s77_s13, 0  ;;  %p88_p2 = scmp.eq.s32.totalorder %s3136_s30, 0 }
   0x7   : > { %p222_p3 = scmp.eq.s32.totalorder %s3208_s9, 1  ;;  %p227_p4 = scmp.ne.s32.totalorder %s3128_s28, %s3124_s27 }
   0x8   : > { %s3224_s14 = scalar_select %p78_p1, %s3132_s29, %s80_s12  }
   0x9   : > { %p89_p5 = por %p88_p2, %p87_p0  ;;  %p3226_p6 = por %p222_p3, %p87_p0 }
   0xa   : > { %p228_p7 = scmp.eq.s32.totalorder %s2616_s10, 1  ;;  %p2618_p9 = scmp.ge.s32.totalorder %s3136_s30, 2 }
   0xc   : > { %p3230_p8 = por %p228_p7, %p227_p4  ;;  %259 = sbr.rel (%p2618_p9) target bundleno = 39 (0x27), region = 36 }
  0x13   : > { %280 = sbr.rel (!%p89_p5) target bundleno = 39 (0x27), region = 48  ;;  %s282_s17 = sand.u32 (%p89_p5), 1, %s3132_s29  }
  0x14   : > { %s2770_s18 = sshll.u32 (%p89_p5), %s3136_s30, 4  ;;  %s2619_s19 = sshll.u32 (%p89_p5), %s282_s17, 8 }
  0x15   : > { %s3242_s22 = scalar_lea.vmem (%p89_p5), %s3852_s2, %s2770_s18  ;;  %s3247_s23 = scalar_lea.vmem (%p89_p5), [#allocation2], %s2619_s19 }
  0x16   : > { %v303_v0 = vld [vmem:[%s3242_s22] sm:$0xff] (%p89_p5)   ;;  %v307_v1 = vld [vmem:[%s3242_s22 + $0x8] sm:$0xff] (%p89_p5)  }
  0x17   : > { %v311_v2 = vld [vmem:[%s3242_s22 + $0x20] sm:$0xff] (%p89_p5)   ;;  %304 = vst [vmem:[%s3247_s23] sm:$0xff] (%p89_p5), %v303_v0   ;;  %308 = vst [vmem:[%s3247_s23 + $0x8] sm:$0xff] (%p89_p5), %v307_v1   ;;  %v315_v3 = vld [vmem:[%s3242_s22 + $0x28] sm:$0xff] (%p89_p5)  }
  0x18   : > { %312 = vst [vmem:[%s3247_s23 + $0x10] sm:$0xff] (%p89_p5), %v311_v2   ;;  %v319_v4 = vld [vmem:[%s3242_s22 + $0x40] sm:$0xff] (%p89_p5)   ;;  %v323_v5 = vld [vmem:[%s3242_s22 + $0x48] sm:$0xff] (%p89_p5)   ;;  %316 = vst [vmem:[%s3247_s23 + $0x18] sm:$0xff] (%p89_p5), %v315_v3  }
  0x19   : > { %320 = vst [vmem:[%s3247_s23 + $0x20] sm:$0xff] (%p89_p5), %v319_v4   ;;  %324 = vst [vmem:[%s3247_s23 + $0x28] sm:$0xff] (%p89_p5), %v323_v5   ;;  %v327_v6 = vld [vmem:[%s3242_s22 + $0x60] sm:$0xff] (%p89_p5)   ;;  %v331_v7 = vld [vmem:[%s3242_s22 + $0x68] sm:$0xff] (%p89_p5)  }
  0x1a   : > { %v335_v8 = vld [vmem:[%s3242_s22 + $0x80] sm:$0xff]   ;;  %328 = vst [vmem:[%s3247_s23 + $0x30] sm:$0xff] %v327_v6   ;;  %332 = vst [vmem:[%s3247_s23 + $0x38] sm:$0xff] %v331_v7   ;;  %v339_v9 = vld [vmem:[%s3242_s22 + $0x88] sm:$0xff]  }
  0x1b   : > { %336 = vst [vmem:[%s3247_s23 + $0x40] sm:$0xff] %v335_v8   ;;  %v343_v10 = vld [vmem:[%s3242_s22 + $0xa0] sm:$0xff]   ;;  %v347_v11 = vld [vmem:[%s3242_s22 + $0xa8] sm:$0xff]   ;;  %340 = vst [vmem:[%s3247_s23 + $0x48] sm:$0xff] %v339_v9  }
  0x1c   : > { %344 = vst [vmem:[%s3247_s23 + $0x50] sm:$0xff] %v343_v10   ;;  %348 = vst [vmem:[%s3247_s23 + $0x58] sm:$0xff] %v347_v11   ;;  %v351_v12 = vld [vmem:[%s3242_s22 + $0xc0] sm:$0xff]   ;;  %v355_v13 = vld [vmem:[%s3242_s22 + $0xc8] sm:$0xff]  }
  0x1d   : > { %v359_v14 = vld [vmem:[%s3242_s22 + $0xe0] sm:$0xff]   ;;  %352 = vst [vmem:[%s3247_s23 + $0x60] sm:$0xff] %v351_v12   ;;  %356 = vst [vmem:[%s3247_s23 + $0x68] sm:$0xff] %v355_v13   ;;  %v363_v15 = vld [vmem:[%s3242_s22 + $0xe8] sm:$0xff]  }
  0x1e   : > { %360 = vst [vmem:[%s3247_s23 + $0x70] sm:$0xff] %v359_v14   ;;  %v367_v16 = vld [vmem:[%s3242_s22 + $0x100] sm:$0xff]   ;;  %v371_v17 = vld [vmem:[%s3242_s22 + $0x108] sm:$0xff]   ;;  %364 = vst [vmem:[%s3247_s23 + $0x78] sm:$0xff] %v363_v15  }
  0x1f   : > { %368 = vst [vmem:[%s3247_s23 + $0x80] sm:$0xff] %v367_v16   ;;  %372 = vst [vmem:[%s3247_s23 + $0x88] sm:$0xff] %v371_v17   ;;  %v375_v18 = vld [vmem:[%s3242_s22 + $0x120] sm:$0xff]   ;;  %v379_v19 = vld [vmem:[%s3242_s22 + $0x128] sm:$0xff]  }
  0x20   : > { %v383_v20 = vld [vmem:[%s3242_s22 + $0x140] sm:$0xff]   ;;  %376 = vst [vmem:[%s3247_s23 + $0x90] sm:$0xff] %v375_v18   ;;  %380 = vst [vmem:[%s3247_s23 + $0x98] sm:$0xff] %v379_v19   ;;  %v387_v21 = vld [vmem:[%s3242_s22 + $0x148] sm:$0xff]  }
  0x21   : > { %384 = vst [vmem:[%s3247_s23 + $0xa0] sm:$0xff] %v383_v20   ;;  %v391_v22 = vld [vmem:[%s3242_s22 + $0x160] sm:$0xff]   ;;  %v395_v23 = vld [vmem:[%s3242_s22 + $0x168] sm:$0xff]   ;;  %388 = vst [vmem:[%s3247_s23 + $0xa8] sm:$0xff] %v387_v21  }
  0x22   : > { %392 = vst [vmem:[%s3247_s23 + $0xb0] sm:$0xff] %v391_v22   ;;  %396 = vst [vmem:[%s3247_s23 + $0xb8] sm:$0xff] %v395_v23   ;;  %v399_v24 = vld [vmem:[%s3242_s22 + $0x180] sm:$0xff]   ;;  %v403_v25 = vld [vmem:[%s3242_s22 + $0x188] sm:$0xff]  }
  0x23   : > { %v407_v26 = vld [vmem:[%s3242_s22 + $0x1a0] sm:$0xff]   ;;  %400 = vst [vmem:[%s3247_s23 + $0xc0] sm:$0xff] %v399_v24   ;;  %404 = vst [vmem:[%s3247_s23 + $0xc8] sm:$0xff] %v403_v25   ;;  %v411_v27 = vld [vmem:[%s3242_s22 + $0x1a8] sm:$0xff]  }
  0x24   : > { %408 = vst [vmem:[%s3247_s23 + $0xd0] sm:$0xff] %v407_v26   ;;  %v415_v28 = vld [vmem:[%s3242_s22 + $0x1c0] sm:$0xff]   ;;  %v419_v29 = vld [vmem:[%s3242_s22 + $0x1c8] sm:$0xff]   ;;  %412 = vst [vmem:[%s3247_s23 + $0xd8] sm:$0xff] %v411_v27  }
  0x25   : > { %416 = vst [vmem:[%s3247_s23 + $0xe0] sm:$0xff] %v415_v28   ;;  %420 = vst [vmem:[%s3247_s23 + $0xe8] sm:$0xff] %v419_v29   ;;  %v423_v30 = vld [vmem:[%s3242_s22 + $0x1e0] sm:$0xff]   ;;  %v427_v31 = vld [vmem:[%s3242_s22 + $0x1e8] sm:$0xff]  }
  0x26   : > { %424 = vst [vmem:[%s3247_s23 + $0xf0] sm:$0xff] %v423_v30   ;;  %428 = vst [vmem:[%s3247_s23 + $0xf8] sm:$0xff] %v427_v31  }
  0x27 PF: > { %p2622_p10 = scmp.ge.s32.totalorder %s3136_s30, 1  ;;  %p580_p11 = scmp.lt.s32.totalorder %s3136_s30, 3 }
  0x29   : > { %p581_p12 = pnand %p2622_p10, %p580_p11 }
  0x2a   : > { %vm674_vm0 = vcmask (!%p581_p12), 1041408   ;;  %v731_v32 = vld [vmem:[%s3854_s4] sm:$0x3] (!%p581_p12)  ;;  %s3316_s26 = sand.u32 (!%p581_p12), 1, %s3128_s28   ;;  %vm667_vm1 = vcmask (!%p581_p12), 31744   ;;  %s2625_s10 = sshll.u32 (!%p581_p12), %s3208_s9, 2 }
  0x2b   : > { %584 = sbr.rel (%p581_p12) target bundleno = 637 (0x27d), region = 89  ;;  %2992 = vmatprep.subr.msk.bf16.mxu1 (!%p581_p12), %vm674_vm0, %v731_v32  ;;  %v900_v33 = vsel (!%p581_p12), %vm674_vm0, %v731_v32, 0  ;;  %s2623_s12 = sshll.u32 (!%p581_p12), %s3316_s26, 8  ;;  %v649_v34 = vld [vmem:[%s3853_s3] sm:$0x3] (!%p581_p12)  ;;  %v3138_v38 = vmov (!%p581_p12), 0  }
  0x2c   : > { %p631_p13 = scmp.lt.s32.totalorder (!%p581_p12), %s2625_s10, 7  ;;  %2852 = vmatpush3.bf16.msra.mxu1 (!%p581_p12), %v900_v33  ;;  %2991 = vmatprep.subr.msk.bf16.mxu0 (!%p581_p12), %vm674_vm0, %v649_v34  ;;  %v676_v35 = vsel (!%p581_p12), %vm674_vm0, %v649_v34, 0  ;;  %s3327_s18 = scalar_lea.vmem (!%p581_p12), [#allocation2], %s2623_s12  ;;  %v3438_v23 = vld [vmem:[%s3856_s6] sm:$0xff] (!%p581_p12)   ;;  %v3451_v27 = vld [vmem:[%s3856_s6 + $0x8] sm:$0xff] (!%p581_p12)  }
  0x2d   : > { %v3038_v36 = vld [vmem:[%s3327_s18] sm:$0xff] (!%p581_p12)   ;;  %2846 = vmatpush3.bf16.msra.mxu0 (!%p581_p12), %v676_v35  ;;  %2993 = vmatprep.subr.msk.bf16.mxu1 (!%p581_p12), %vm674_vm0, %v731_v32  ;;  %v3039_v37 = vld [vmem:[%s3327_s18 + $0x8] sm:$0xff] (!%p581_p12)   ;;  %v3042_v39 = vld [vmem:[%s3327_s18 + $0x10] sm:$0xff] (!%p581_p12)   ;;  %s2624_s21 = sshll.u32 (!%p581_p12), %s3316_s26, 5  ;;  %s2771_s24 = sshll.u32 (!%p581_p12), %s3208_s9, 9 }
  0x2e   : > { %3037 = vset.pattern.permute.xlu1 (!%p581_p12), %v3138_v38  ;;  %3036 = vset.pattern.permute.xlu0 (!%p581_p12), %v3138_v38  ;;  %v3043_v46 = vld [vmem:[%s3327_s18 + $0x18] sm:$0xff] (!%p581_p12)   ;;  %v3044_v48 = vld [vmem:[%s3327_s18 + $0x20] sm:$0xff] (!%p581_p12)   ;;  %v3045_v53 = vld [vmem:[%s3327_s18 + $0x28] sm:$0xff] (!%p581_p12)   ;;  %s629_s25 = scalar_lea.vmem (!%p581_p12), [#allocation3], %s2624_s21  ;;  %s3804_s9 = scalar_lea.hbm (!%p581_p12), %s3858_s8, %s2771_s24 }
  0x2f   : > { %2853 = vmatprep.mubr.msk.bf16.mxu1 (!%p581_p12), %vm667_vm1, %v3038_v36  ;;  %v3046_v54 = vld [vmem:[%s3327_s18 + $0x30] sm:$0xff] (!%p581_p12)   ;;  %v3047_v59 = vld [vmem:[%s3327_s18 + $0x38] sm:$0xff] (!%p581_p12)   ;;  %v3048_v60 = vld [vmem:[%s3327_s18 + $0x40] sm:$0xff] (!%p581_p12)   ;;  %2885 = vmatprep.subr.bf16.mxu0 (!%p581_p12), %v3438_v23  ;;  %s2510_s17 = scalar_lea.sflag (!%p581_p12), [#allocation4], %s3316_s26 }
  0x30   : > { %2854 = vmatmul.mubr.msk.bf16.vlgmr.msra.gmra.mrb[0].mxu1 (!%p581_p12), %vm667_vm1, %v3039_v37  ;;  %v3049_v1 = vld [vmem:[%s3327_s18 + $0x48] sm:$0xff] (!%p581_p12)   ;;  %v3050_v2 = vld [vmem:[%s3327_s18 + $0x50] sm:$0xff] (!%p581_p12)   ;;  %v3051_v6 = vld [vmem:[%s3327_s18 + $0x58] sm:$0xff] (!%p581_p12)  }
  0x31   : > { %2922 = vmatpush3.bf16.msra.mxu1 (!%p581_p12), %v900_v33  ;;  %2857 = vmatprep.mubr.msk.bf16.mxu1 (!%p581_p12), %vm667_vm1, %v3042_v39  ;;  %v3052_v7 = vld [vmem:[%s3327_s18 + $0x60] sm:$0xff] (!%p581_p12)   ;;  %v3053_v8 = vld [vmem:[%s3327_s18 + $0x68] sm:$0xff] (!%p581_p12)   ;;  %v3054_v9 = vld [vmem:[%s3327_s18 + $0x70] sm:$0xff] (!%p581_p12)  }
  0x32   : > { %s3866_s10 = smov (!%p631_p13, %s2625_s10), 7  ;;  %v3055_v10 = vld [vmem:[%s3327_s18 + $0x78] sm:$0xff]   ;;  %v3056_v11 = vld [vmem:[%s3327_s18 + $0x80] sm:$0xff]   ;;  %v3057_v12 = vld [vmem:[%s3327_s18 + $0x88] sm:$0xff]  }
  0x33   : > { %s2626_s19 = sshll.u32 %s3866_s10, 3  ;;  %s2628_s20 = sshll.u32 %s3866_s10, 2  ;;  %v3058_v13 = vld [vmem:[%s3327_s18 + $0x90] sm:$0xff]   ;;  %v3059_v14 = vld [vmem:[%s3327_s18 + $0x98] sm:$0xff]   ;;  %v3060_v15 = vld [vmem:[%s3327_s18 + $0xa0] sm:$0xff]  }
  0x34   : > { %s634_s23 = scalar_lea.vmem %s3850_s0, %s2626_s19  ;;  %s640_s12 = scalar_lea.vmem %s3851_s1, %s2628_s20  ;;  %v3061_v16 = vld [vmem:[%s3327_s18 + $0xa8] sm:$0xff]   ;;  %v3062_v17 = vld [vmem:[%s3327_s18 + $0xb0] sm:$0xff]   ;;  %v3063_v18 = vld [vmem:[%s3327_s18 + $0xb8] sm:$0xff]  }
  0x35   : > { %v3040_v40 = vld [vmem:[%s640_s12] sm:$0xff]   ;;  %v3345_v42 = vld [vmem:[%s634_s23 + $0x10] sm:$0xff]  ;;  %v3349_v43 = vld [vmem:[%s634_s23 + $0x8] sm:$0xff] }
  0x36   : > { %v3343_v41 = vld [vmem:[%s634_s23] sm:$0xff]  ;;  %2847 = vmatprep.mubr.msk.bf16.mxu0 %vm667_vm1, %v3040_v40  ;;  %v3351_v44 = vld [vmem:[%s634_s23 + $0x18] sm:$0xff]  ;;  %vm1367_vm2 = vcmp.gt.s32.totalorder %v3345_v42, 0  ;;  %v3041_v45 = vld [vmem:[%s640_s12 + $0x8] sm:$0xff]   ;;  %vm1366_vm5 = vcmp.gt.s32.totalorder %v3349_v43, 0  ;;  %vm1370_vm6 = vcmp.gt.s32.totalorder %v3349_v43, 1 }
  0x37   : > { %v1399_v47 = vsel %vm1367_vm2, 1, %v3138_v38  ;;  %vm1365_vm3 = vcmp.gt.s32.totalorder %v3343_v41, 0  ;;  %2848 = vmatmul.mubr.msk.bf16.vlgmr.msra.gmra.mrb[0].mxu0 %vm667_vm1, %v3041_v45  ;;  %vm1368_vm4 = vcmp.gt.s32.totalorder %v3351_v44, 0  ;;  %v1398_v51 = vsel %vm1366_vm5, 1, %v3138_v38  ;;  %v3064_v19 = vld [vmem:[%s3327_s18 + $0xc0] sm:$0xff]   ;;  %v3065_v22 = vld [vmem:[%s3327_s18 + $0xc8] sm:$0xff]  }
  0x38   : > { %1436 = vperm.xlu1 %3037, %v1399_v47   ;;  %v1397_v49 = vsel %vm1365_vm3, 1, %v3138_v38  ;;  %v1400_v50 = vsel %vm1368_vm4, 1, %v3138_v38  ;;  %2858 = vmatmul.mubr.msk.bf16.gmra.mrb[4].mxu1 %vm667_vm1, %v3043_v46  ;;  %v1402_v52 = vsel %vm1370_vm6, 1, %v3138_v38  ;;  %vm1369_vm7 = vcmp.gt.s32.totalorder %v3343_v41, 1  ;;  %v3066_v24 = vld [vmem:[%s3327_s18 + $0xd0] sm:$0xff]   ;;  %v3067_v30 = vld [vmem:[%s3327_s18 + $0xd8] sm:$0xff]  }
  0x39   : > { %1430 = vperm.xlu0 %3036, %v1397_v49   ;;  %2861 = vmatprep.mubr.msk.bf16.mxu1 %vm667_vm1, %v3044_v48  ;;  %v1401_v55 = vsel %vm1369_vm7, 1, %v3138_v38  ;;  %vm1372_vm8 = vcmp.gt.s32.totalorder %v3351_v44, 1  ;;  %vm1371_vm9 = vcmp.gt.s32.totalorder %v3345_v42, 1  ;;  %vm1374_vm10 = vcmp.gt.s32.totalorder %v3349_v43, 2  ;;  %v3068_v31 = vld [vmem:[%s3327_s18 + $0xe0] sm:$0xff]   ;;  %v3069_v36 = vld [vmem:[%s3327_s18 + $0xe8] sm:$0xff]  }
  0x3a   : > { %v1404_v56 = vsel %vm1372_vm8, 1, %v3138_v38  ;;  %v1403_v57 = vsel %vm1371_vm9, 1, %v3138_v38  ;;  %v1406_v58 = vsel %vm1374_vm10, 1, %v3138_v38  ;;  %vm1373_vm11 = vcmp.gt.s32.totalorder %v3343_v41, 2  ;;  %2886 = vmatpush3.bf16.msra.mxu0 %v3438_v23  ;;  %v3070_v37 = vld [vmem:[%s3327_s18 + $0xf0] sm:$0xff]   ;;  %v3071_v47 = vld [vmem:[%s3327_s18 + $0xf8] sm:$0xff]  }
  0x3b   : > { %v1405_v61 = vsel %vm1373_vm11, 1, %v3138_v38  ;;  %vm1376_vm12 = vcmp.gt.s32.totalorder %v3351_v44, 2  ;;  %vm1375_vm13 = vcmp.gt.s32.totalorder %v3345_v42, 2  ;;  %vm1378_vm14 = vcmp.gt.s32.totalorder %v3349_v43, 3  ;;  %2887 = vmatprep.subr.bf16.mxu0 %v3451_v27  ;;  %s2523_s12 = sshll.u32 %s629_s25, 4  ;;  %s3139_s18 = smov [#allocation3]   ;;  %s3806_s12 = int_to_ptr.vmem [resolvable:$true] %s2523_s12 }
  0x3c   : > { %1439 = vperm.xlu1 %3037, %v1400_v50   ;;  %v1408_v62 = vsel %vm1376_vm12, 1, %v3138_v38  ;;  %v1407_v63 = vsel %vm1375_vm13, 1, %v3138_v38  ;;  %v1410_v0 = vsel %vm1378_vm14, 1, %v3138_v38  ;;  %vm1377_vm15 = vcmp.gt.s32.totalorder %v3343_v41, 3  ;;  %s3074_s19 = scalar_lea.vmem %s3806_s12, 512  ;;  %s3078_s20 = sshll.u32 %s3139_s18, 4  ;;  %s3079_s20 = int_to_ptr.vmem [resolvable:$false] %s3078_s20 }
  0x3d   : > { %1433 = vperm.xlu0 %3036, %v1398_v51   ;;  %v1409_v3 = vsel %vm1377_vm15, 1, %v3138_v38  ;;  %vm1380_vm0 = vcmp.gt.s32.totalorder %v3351_v44, 3  ;;  %vm1379_vm2 = vcmp.gt.s32.totalorder %v3345_v42, 3  ;;  %vm1382_vm3 = vcmp.gt.s32.totalorder %v3349_v43, 4  ;;  %p3075_p0 = scmp.ne.s32.totalorder %s3806_s12, %s3074_s19  ;;  %s3080_s21 = scalar_lea.vmem %s3079_s20, 1024 }
  0x3e   : > { %v1412_v4 = vsel %vm1380_vm0, 1, %v3138_v38  ;;  %v1411_v5 = vsel %vm1379_vm2, 1, %v3138_v38  ;;  %vm1381_vm4 = vcmp.gt.s32.totalorder %v3343_v41, 4  ;;  %v1414_v20 = vsel %vm1382_vm3, 1, %v3138_v38  ;;  %2888 = vmatpush3.bf16.msra.mxu0 %v3451_v27  ;;  %p3081_p3 = scmp.lt.s32.totalorder %s3806_s12, %s3079_s20  ;;  %p3082_p4 = scmp.lt.s32.totalorder %s3080_s21, %s3074_s19 }
  0x3f   : > { %v1413_v21 = vsel %vm1381_vm4, 1, %v3138_v38  ;;  %vm1384_vm5 = vcmp.gt.s32.totalorder %v3351_v44, 4  ;;  %vm1383_vm6 = vcmp.gt.s32.totalorder %v3345_v42, 4  ;;  %vm1386_vm7 = vcmp.gt.s32.totalorder %v3349_v43, 5  ;;  %2955 = vmatprep.subr.bf16.mxu0 %v3438_v23  ;;  %p3076_p1 = pnand %p3075_p0, %p3226_p6 }
  0x40   : > { %1445 = vperm.xlu1 %3037, %v1402_v52   ;;  %2862 = vmatmul.mubr.msk.bf16.gmra.mrb[8].mxu1 %vm667_vm1, %v3045_v53  ;;  %v1416_v25 = vsel %vm1384_vm5, 1, %v3138_v38  ;;  %v1415_v26 = vsel %vm1383_vm6, 1, %v3138_v38  ;;  %vm1385_vm8 = vcmp.gt.s32.totalorder %v3343_v41, 5  ;;  %v1418_v28 = vsel %vm1386_vm7, 1, %v3138_v38  ;;  %p3083_p5 = por %p3082_p4, %p3081_p3 }
  0x41   : > { %1442 = vperm.xlu0 %3036, %v1401_v55   ;;  %2865 = vmatprep.mubr.msk.bf16.mxu1 %vm667_vm1, %v3046_v54  ;;  %v1417_v29 = vsel %vm1385_vm8, 1, %v3138_v38  ;;  %vm1388_vm9 = vcmp.gt.s32.totalorder %v3351_v44, 5  ;;  %vm1387_vm10 = vcmp.gt.s32.totalorder %v3345_v42, 5  ;;  %vm1390_vm11 = vcmp.gt.s32.totalorder %v3349_v43, 6  ;;  %p3077_p2 = pneg %p3076_p1 }
  0x42   : > { %v1420_v32 = vsel %vm1388_vm9, 1, %v3138_v38  ;;  %v1419_v33 = vsel %vm1387_vm10, 1, %v3138_v38  ;;  %vm1389_vm12 = vcmp.gt.s32.totalorder %v3343_v41, 6  ;;  %v1422_v34 = vsel %vm1390_vm11, 1, %v3138_v38 }
  0x43   : > { %v1421_v35 = vsel %vm1389_vm12, 1, %v3138_v38  ;;  %vm1392_vm13 = vcmp.gt.s32.totalorder %v3351_v44, 6  ;;  %vm1391_vm14 = vcmp.gt.s32.totalorder %v3345_v42, 6  ;;  %vm1394_vm15 = vcmp.gt.s32.totalorder %v3349_v43, 7  ;;  %p3084_p7 = pnand %p3083_p5, %p3077_p2 }
  0x44   : > { %1451 = vperm.xlu1 %3037, %v1404_v56   ;;  %v1424_v39 = vsel %vm1392_vm13, 1, %v3138_v38  ;;  %v1423_v40 = vsel %vm1391_vm14, 1, %v3138_v38  ;;  %vm1393_vm0 = vcmp.gt.s32.totalorder %v3343_v41, 7  ;;  %v1426_v45 = vsel %vm1394_vm15, 1, %v3138_v38 }
  0x45   : > { %1448 = vperm.xlu0 %3036, %v1403_v57   ;;  %v1425_v46 = vsel %vm1393_vm0, 1, %v3138_v38  ;;  %vm1396_vm2 = vcmp.gt.s32.totalorder %v3351_v44, 7  ;;  %vm1395_vm3 = vcmp.gt.s32.totalorder %v3345_v42, 7  ;;  %vm2231_vm4 = vcmp.gt.s32.totalorder %v3349_v43, 8 }
  0x46   : > { %v1428_v48 = vsel %vm1396_vm2, 1, %v3138_v38  ;;  %v1427_v49 = vsel %vm1395_vm3, 1, %v3138_v38  ;;  %vm2230_vm5 = vcmp.gt.s32.totalorder %v3343_v41, 8  ;;  %v2263_v50 = vsel %vm2231_vm4, 1, %v3138_v38 }
  0x47   : > { %v2262_v51 = vsel %vm2230_vm5, 1, %v3138_v38  ;;  %vm2233_vm6 = vcmp.gt.s32.totalorder %v3351_v44, 8  ;;  %vm2232_vm7 = vcmp.gt.s32.totalorder %v3345_v42, 8  ;;  %vm2234_vm8 = vcmp.gt.s32.totalorder %v3343_v41, 9 }
  0x48   : > { %1457 = vperm.xlu1 %3037, %v1406_v58   ;;  %2866 = vmatmul.mubr.msk.bf16.gmra.mrb[12].mxu1 %vm667_vm1, %v3047_v59  ;;  %v2265_v52 = vsel %vm2233_vm6, 1, %v3138_v38  ;;  %v2264_v53 = vsel %vm2232_vm7, 1, %v3138_v38  ;;  %v2266_v55 = vsel %vm2234_vm8, 1, %v3138_v38  ;;  %vm2237_vm9 = vcmp.gt.s32.totalorder %v3351_v44, 9 }
  0x49   : > { %1454 = vperm.xlu0 %3036, %v1405_v61   ;;  %2869 = vmatprep.mubr.msk.bf16.mxu1 %vm667_vm1, %v3048_v60  ;;  %vm2236_vm10 = vcmp.gt.s32.totalorder %v3345_v42, 9  ;;  %v2269_v56 = vsel %vm2237_vm9, 1, %v3138_v38  ;;  %vm2239_vm11 = vcmp.gt.s32.totalorder %v3349_v43, 10  ;;  %vm2238_vm12 = vcmp.gt.s32.totalorder %v3343_v41, 10 }
  0x4a   : > { %v2268_v57 = vsel %vm2236_vm10, 1, %v3138_v38  ;;  %v2271_v58 = vsel %vm2239_vm11, 1, %v3138_v38  ;;  %v2270_v59 = vsel %vm2238_vm12, 1, %v3138_v38  ;;  %vm2241_vm13 = vcmp.gt.s32.totalorder %v3351_v44, 10 }
  0x4b   : > { %vm2240_vm14 = vcmp.gt.s32.totalorder %v3345_v42, 10  ;;  %v2273_v60 = vsel %vm2241_vm13, 1, %v3138_v38  ;;  %vm2243_vm15 = vcmp.gt.s32.totalorder %v3349_v43, 11  ;;  %vm2242_vm0 = vcmp.gt.s32.totalorder %v3343_v41, 11 }
  0x4c   : > { %1463 = vperm.xlu1 %3037, %v1408_v62   ;;  %v2272_v61 = vsel %vm2240_vm14, 1, %v3138_v38  ;;  %v2275_v62 = vsel %vm2243_vm15, 1, %v3138_v38  ;;  %vm2245_vm2 = vcmp.gt.s32.totalorder %v3351_v44, 11  ;;  %vm2244_vm3 = vcmp.gt.s32.totalorder %v3345_v42, 11 }
  0x4d   : > { %1460 = vperm.xlu0 %3036, %v1407_v63   ;;  %v2274_v63 = vsel %vm2242_vm0, 1, %v3138_v38  ;;  %vm2247_vm4 = vcmp.gt.s32.totalorder %v3349_v43, 12  ;;  %vm2246_vm5 = vcmp.gt.s32.totalorder %v3343_v41, 12  ;;  %vm2249_vm6 = vcmp.gt.s32.totalorder %v3351_v44, 12 }
  0x4e   : > { %vm2248_vm7 = vcmp.gt.s32.totalorder %v3345_v42, 12  ;;  %vm2250_vm8 = vcmp.gt.s32.totalorder %v3343_v41, 13  ;;  %vm2253_vm9 = vcmp.gt.s32.totalorder %v3351_v44, 13  ;;  %vm2252_vm10 = vcmp.gt.s32.totalorder %v3345_v42, 13 }
  0x4f   : > { %vm2255_vm11 = vcmp.gt.s32.totalorder %v3349_v43, 14  ;;  %vm2254_vm12 = vcmp.gt.s32.totalorder %v3343_v41, 14  ;;  %vm2257_vm13 = vcmp.gt.s32.totalorder %v3351_v44, 14  ;;  %vm2256_vm14 = vcmp.gt.s32.totalorder %v3345_v42, 14 }
  0x50   : > { %1469 = vperm.xlu1 %3037, %v1410_v0   ;;  %2870 = vmatmul.mubr.msk.bf16.gmra.mrb[16].mxu1 %vm667_vm1, %v3049_v1  ;;  %v2277_v0 = vsel %vm2245_vm2, 1, %v3138_v38  ;;  %v2276_v1 = vsel %vm2244_vm3, 1, %v3138_v38  ;;  %vm2259_vm15 = vcmp.gt.s32.totalorder %v3349_v43, 15  ;;  %vm2258_vm0 = vcmp.gt.s32.totalorder %v3343_v41, 15 }
  0x51   : > { %1466 = vperm.xlu0 %3036, %v1409_v3   ;;  %2873 = vmatprep.mubr.msk.bf16.mxu1 %vm667_vm1, %v3050_v2  ;;  %v2279_v2 = vsel %vm2247_vm4, 1, %v3138_v38  ;;  %v2278_v3 = vsel %vm2246_vm5, 1, %v3138_v38  ;;  %vm2261_vm2 = vcmp.gt.s32.totalorder %v3351_v44, 15  ;;  %vm2260_vm3 = vcmp.gt.s32.totalorder %v3345_v42, 15 }
  0x52   : > { %vm1155_vm4 = vcmask 261120  }
  0x54   : > { %1475 = vperm.xlu1 %3037, %v1412_v4   ;;  %v2281_v4 = vsel %vm2249_vm6, 1, %v3138_v38 }
  0x55   : > { %1472 = vperm.xlu0 %3036, %v1411_v5   ;;  %v2280_v5 = vsel %vm2248_vm7, 1, %v3138_v38 }
  0x58   : > { %2874 = vmatmul.mubr.msk.bf16.gmra.mrb[20].mxu1 %vm667_vm1, %v3051_v6  ;;  %1481 = vperm.xlu1 %3037, %v1414_v20   ;;  %v2629_v20 = vld [vmem:[%s3855_s5] ss:$0 sm:$0xff] }
  0x59   : > { %2877 = vmatprep.mubr.msk.bf16.mxu1 %vm667_vm1, %v3052_v7  ;;  %1478 = vperm.xlu0 %3036, %v1413_v21   ;;  %v2282_v7 = vsel %vm2250_vm8, 1, %v3138_v38 }
  0x5c   : > { %1487 = vperm.xlu1 %3037, %v1416_v25  }
  0x5d   : > { %1484 = vperm.xlu0 %3036, %v1415_v26  }
  0x60   : > { %2878 = vmatmul.mubr.msk.bf16.gmra.mrb[24].mxu1 %vm667_vm1, %v3053_v8  ;;  %1493 = vperm.xlu1 %3037, %v1418_v28   ;;  %v2285_v8 = vsel %vm2253_vm9, 1, %v3138_v38 }
  0x61   : > { %2881 = vmatprep.mubr.msk.bf16.mxu1 %vm667_vm1, %v3054_v9  ;;  %1490 = vperm.xlu0 %3036, %v1417_v29   ;;  %v2284_v9 = vsel %vm2252_vm10, 1, %v3138_v38 }
  0x64   : > { %1499 = vperm.xlu1 %3037, %v1420_v32  }
  0x65   : > { %1496 = vperm.xlu0 %3036, %v1419_v33  }
  0x68   : > { %2882 = vmatmul.mubr.msk.bf16.gmra.mrb[28].mxu1 %vm667_vm1, %v3055_v10  ;;  %1505 = vperm.xlu1 %3037, %v1422_v34   ;;  %v2287_v10 = vsel %vm2255_vm11, 1, %v3138_v38 }
  0x69   : > { %2923 = vmatprep.mubr.msk.bf16.mxu1 %vm667_vm1, %v3056_v11  ;;  %1502 = vperm.xlu0 %3036, %v1421_v35   ;;  %v2286_v11 = vsel %vm2254_vm12, 1, %v3138_v38 }
  0x6c   : > { %1511 = vperm.xlu1 %3037, %v1424_v39  }
  0x6d   : > { %1508 = vperm.xlu0 %3036, %v1423_v40  }
  0x70   : > { %2924 = vmatmul.mubr.msk.bf16.vlgmr.msra.gmra.mrb[32].mxu1 %vm667_vm1, %v3057_v12  ;;  %1517 = vperm.xlu1 %3037, %v1426_v45   ;;  %v2289_v12 = vsel %vm2257_vm13, 1, %v3138_v38 }
  0x71   : > { %2927 = vmatprep.mubr.msk.bf16.mxu1 %vm667_vm1, %v3058_v13  ;;  %1514 = vperm.xlu0 %3036, %v1425_v46   ;;  %v2288_v13 = vsel %vm2256_vm14, 1, %v3138_v38 }
  0x74   : > { %1523 = vperm.xlu1 %3037, %v1428_v48  }
  0x75   : > { %1520 = vperm.xlu0 %3036, %v1427_v49  }
  0x78   : > { %2928 = vmatmul.mubr.msk.bf16.gmra.mrb[36].mxu1 %vm667_vm1, %v3059_v14  ;;  %2298 = vperm.xlu1 %3037, %v2263_v50   ;;  %v2291_v14 = vsel %vm2259_vm15, 1, %v3138_v38 }
  0x79   : > { %2931 = vmatprep.mubr.msk.bf16.mxu1 %vm667_vm1, %v3060_v15  ;;  %2295 = vperm.xlu0 %3036, %v2262_v51   ;;  %v2290_v15 = vsel %vm2258_vm0, 1, %v3138_v38 }
  0x7c   : > { %2304 = vperm.xlu1 %3037, %v2265_v52  }
  0x7d   : > { %2301 = vperm.xlu0 %3036, %v2264_v53  }
  0x80   : > { %2932 = vmatmul.mubr.msk.bf16.gmra.mrb[40].mxu1 %vm667_vm1, %v3061_v16  ;;  %v2293_v16 = vsel %vm2261_vm2, 1, %v3138_v38 }
  0x81   : > { %2935 = vmatprep.mubr.msk.bf16.mxu1 %vm667_vm1, %v3062_v17  ;;  %2307 = vperm.xlu0 %3036, %v2266_v55   ;;  %v2292_v17 = vsel %vm2260_vm3, 1, %v3138_v38 }
  0x85   : > { %2313 = vperm.xlu0 %3036, %v2268_v57  }
  0x88   : > { %2936 = vmatmul.mubr.msk.bf16.gmra.mrb[44].mxu1 %vm667_vm1, %v3063_v18 }
  0x89   : > { %2939 = vmatprep.mubr.msk.bf16.mxu1 %vm667_vm1, %v3064_v19  ;;  %2319 = vperm.xlu0 %3036, %v2270_v59  }
  0x8d   : > { %2325 = vperm.xlu0 %3036, %v2272_v61  }
  0x90   : > { %2940 = vmatmul.mubr.msk.bf16.gmra.mrb[48].mxu1 %vm667_vm1, %v3065_v22 }
  0x91   : > { %2943 = vmatprep.mubr.msk.bf16.mxu1 %vm667_vm1, %v3066_v24  ;;  %2331 = vperm.xlu0 %3036, %v2274_v63  }
  0x95   : > { %2337 = vperm.xlu0 %3036, %v2276_v1  }
  0x98   : > { %2944 = vmatmul.mubr.msk.bf16.gmra.mrb[52].mxu1 %vm667_vm1, %v3067_v30 }
  0x99   : > { %2947 = vmatprep.mubr.msk.bf16.mxu1 %vm667_vm1, %v3068_v31  ;;  %2343 = vperm.xlu0 %3036, %v2278_v3  }
  0x9d   : > { %2349 = vperm.xlu0 %3036, %v2280_v5  }
  0xa0   : > { %2948 = vmatmul.mubr.msk.bf16.gmra.mrb[56].mxu1 %vm667_vm1, %v3069_v36 }
  0xa1   : > { %2951 = vmatprep.mubr.msk.bf16.mxu1 %vm667_vm1, %v3070_v37  ;;  %2355 = vperm.xlu0 %3036, %v2282_v7  }
  0xa5   : > { %2361 = vperm.xlu0 %3036, %v2284_v9  }
  0xa8   : > { %2952 = vmatmul.mubr.msk.bf16.gmra.mrb[60].mxu1 %vm667_vm1, %v3071_v47  ;;  %vm2235_vm1 = vcmp.gt.s32.totalorder %v3349_v43, 9 }
  0xa9   : > { %v2267_v54 = vsel %vm2235_vm1, 1, %v3138_v38  ;;  %vm2251_vm1 = vcmp.gt.s32.totalorder %v3349_v43, 13  ;;  %2367 = vperm.xlu0 %3036, %v2286_v11  }
  0xaa   : > { %2310 = vperm.xlu1 %3037, %v2267_v54   ;;  %v2283_v6 = vsel %vm2251_vm1, 1, %v3138_v38 }
  0xad   : > { %2373 = vperm.xlu0 %3036, %v2288_v13  }
  0xae   : > { %2316 = vperm.xlu1 %3037, %v2269_v56  }
  0xb1   : > { %2379 = vperm.xlu0 %3036, %v2290_v15  }
  0xb2   : > { %2322 = vperm.xlu1 %3037, %v2271_v58  }
  0xb5   : > { %2385 = vperm.xlu0 %3036, %v2292_v17  }
  0xb6   : > { %2328 = vperm.xlu1 %3037, %v2273_v60  }
  0xba   : > { %2334 = vperm.xlu1 %3037, %v2275_v62  }
  0xbe   : > { %2340 = vperm.xlu1 %3037, %v2277_v0  }
  0xc2   : > { %2346 = vperm.xlu1 %3037, %v2279_v2  }
  0xc6   : > { %2352 = vperm.xlu1 %3037, %v2281_v4  }
  0xca   : > { %2358 = vperm.xlu1 %3037, %v2283_v6  }
  0xce   : > { %2364 = vperm.xlu1 %3037, %v2285_v8  }
  0xd2   : > { %2370 = vperm.xlu1 %3037, %v2287_v10  }
  0xd6   : > { %2376 = vperm.xlu1 %3037, %v2289_v12  }
  0xda   : > { %2382 = vperm.xlu1 %3037, %v2291_v14  }
  0xde   : > { %2388 = vperm.xlu1 %3037, %v2293_v16  }
 0x103   : > { %v2855_v18 = vpop.f32.mrb[0].mxu1 }
 0x104   : > { %v936_v43 = vpop.f32.mrb[1].mxu1 }
 0x105   : > { %v2856_v19 = vpop.f32.mrb[2].mxu1 }
 0x106   : > { %v939_v41 = vpop.f32.mrb[3].mxu1 }
 0x10a   : > { %v2849_v21 = vpop.f32.mrb[0].mxu0 }
 0x10b   : > { %v3558_v22 = vadd.f32 %v2849_v21, %v2629_v20  ;;  %v712_v44 = vpop.f32.mrb[1].mxu0  ;;  %v2859_v25 = vpop.f32.mrb[4].mxu1 }
 0x10c   : > { %v3560_v24 = vadd.f32 %v2629_v20, %v712_v44  ;;  %v2850_v42 = vpop.f32.mrb[2].mxu0  ;;  %v952_v29 = vpop.f32.mrb[5].mxu1 }
 0x10d   : > { %v3562_v26 = vadd.f32 %v2850_v42, %v2629_v20  ;;  %v715_v38 = vpop.f32.mrb[3].mxu0  ;;  %v1069_v28 = vadd.f32 %v2859_v25, %v3558_v22  ;;  %v1065_v30 = vadd.f32 %v2855_v18, %v3558_v22  ;;  %v2860_v33 = vpop.f32.mrb[6].mxu1 }
 0x10e   : > { %v3566_v31 = vadd.f32 %v2629_v20, %v715_v38  ;;  %v1067_v32 = vadd.f32 %v952_v29, %v3560_v24  ;;  %v1063_v34 = vadd.f32 %v936_v43, %v3560_v24  ;;  %v955_v36 = vpop.f32.mrb[7].mxu1 }
 0x10f   : > { %v1070_v35 = vadd.f32 %v2860_v33, %v3562_v26  ;;  %v1066_v37 = vadd.f32 %v2856_v19, %v3562_v26  ;;  %v1101_v45 = vmax.f32 %v1069_v28, 0.0  ;;  %v1097_v47 = vmax.f32 %v1065_v30, 0.0 }
 0x110   : > { %v1068_v39 = vadd.f32 %v955_v36, %v3566_v31  ;;  %v1064_v40 = vadd.f32 %v939_v41, %v3566_v31  ;;  %v1099_v49 = vmax.f32 %v1067_v32, 0.0  ;;  %v1095_v51 = vmax.f32 %v1063_v34, 0.0 }
 0x111   : > { %v1102_v46 = vmax.f32 %v1070_v35, 0.0  ;;  %v1098_v48 = vmax.f32 %v1066_v37, 0.0 }
 0x112   : > { %v1100_v50 = vmax.f32 %v1068_v39, 0.0  ;;  %v1096_v52 = vmax.f32 %v1064_v40, 0.0 }
 0x113   : > { %v1130_v53 = vpack.c.bf16 %v1102_v46, %v1101_v45  ;;  %v1128_v54 = vpack.c.bf16 %v1098_v48, %v1097_v47  ;;  %v2863_v56 = vpop.f32.mrb[8].mxu1 }
 0x114   : > { %v1129_v55 = vpack.c.bf16 %v1100_v50, %v1099_v49  ;;  %v1127_v57 = vpack.c.bf16 %v1096_v52, %v1095_v51  ;;  %v1073_v58 = vadd.f32 %v2863_v56, %v3558_v22  ;;  %v968_v59 = vpop.f32.mrb[9].mxu1 }
 0x115   : > { %v1071_v60 = vadd.f32 %v968_v59, %v3560_v24  ;;  %v2864_v61 = vpop.f32.mrb[10].mxu1 }
 0x116   : > { %2889 = vmatprep.mubr.msk.bf16.mxu0 %vm1155_vm4, %v1127_v57  ;;  %v1074_v62 = vadd.f32 %v2864_v61, %v3562_v26  ;;  %v971_v63 = vpop.f32.mrb[11].mxu1  ;;  %v1105_v1 = vmax.f32 %v1073_v58, 0.0 }
 0x117   : > { %2890 = vmatmul.mubr.msk.bf16.vlgmr.msra.gmra.mrb[4].mxu0 %vm1155_vm4, %v1128_v54  ;;  %v1072_v0 = vadd.f32 %v971_v63, %v3566_v31  ;;  %v1103_v3 = vmax.f32 %v1071_v60, 0.0 }
 0x118   : > { %2956 = vmatpush3.bf16.msra.mxu0 %v3438_v23  ;;  %2893 = vmatprep.mubr.msk.bf16.mxu0 %vm1155_vm4, %v1129_v55  ;;  %v1106_v2 = vmax.f32 %v1074_v62, 0.0 }
 0x119   : > { %2957 = vmatprep.subr.bf16.mxu0 %v3451_v27  ;;  %v1104_v4 = vmax.f32 %v1072_v0, 0.0 }
 0x11a   : > { %v1132_v5 = vpack.c.bf16 %v1106_v2, %v1105_v1 }
 0x11b   : > { %v1131_v6 = vpack.c.bf16 %v1104_v4, %v1103_v3  ;;  %v2867_v7 = vpop.f32.mrb[12].mxu1 }
 0x11c   : > { %2958 = vmatpush3.bf16.msra.mxu0 %v3451_v27  ;;  %v1077_v8 = vadd.f32 %v2867_v7, %v3558_v22  ;;  %v984_v9 = vpop.f32.mrb[13].mxu1 }
 0x11d   : > { %v1075_v23 = vadd.f32 %v984_v9, %v3560_v24  ;;  %v2868_v10 = vpop.f32.mrb[14].mxu1 }
 0x11e   : > { %v1078_v11 = vadd.f32 %v2868_v10, %v3562_v26  ;;  %v987_v12 = vpop.f32.mrb[15].mxu1  ;;  %v1109_v14 = vmax.f32 %v1077_v8, 0.0 }
 0x11f   : > { %2894 = vmatmul.mubr.msk.bf16.gmra.mrb[8].mxu0 %vm1155_vm4, %v1130_v53  ;;  %v1076_v13 = vadd.f32 %v987_v12, %v3566_v31  ;;  %v1107_v16 = vmax.f32 %v1075_v23, 0.0 }
 0x120   : > { %2897 = vmatprep.mubr.msk.bf16.mxu0 %vm1155_vm4, %v1131_v6  ;;  %v1110_v15 = vmax.f32 %v1078_v11, 0.0 }
 0x121   : > { %v1108_v17 = vmax.f32 %v1076_v13, 0.0 }
 0x122   : > { %v1134_v27 = vpack.c.bf16 %v1110_v15, %v1109_v14 }
 0x123   : > { %v1133_v18 = vpack.c.bf16 %v1108_v17, %v1107_v16  ;;  %v2871_v43 = vpop.f32.mrb[16].mxu1 }
 0x124   : > { %v1081_v19 = vadd.f32 %v2871_v43, %v3558_v22  ;;  %v1000_v41 = vpop.f32.mrb[17].mxu1 }
 0x125   : > { %v1079_v20 = vadd.f32 %v1000_v41, %v3560_v24  ;;  %v2872_v21 = vpop.f32.mrb[18].mxu1 }
 0x126   : > { %v1082_v44 = vadd.f32 %v2872_v21, %v3562_v26  ;;  %v1003_v42 = vpop.f32.mrb[19].mxu1  ;;  %v1113_v38 = vmax.f32 %v1081_v19, 0.0 }
 0x127   : > { %2898 = vmatmul.mubr.msk.bf16.gmra.mrb[12].mxu0 %vm1155_vm4, %v1132_v5  ;;  %v1080_v25 = vadd.f32 %v1003_v42, %v3566_v31  ;;  %v1111_v29 = vmax.f32 %v1079_v20, 0.0 }
 0x128   : > { %2901 = vmatprep.mubr.msk.bf16.mxu0 %vm1155_vm4, %v1133_v18  ;;  %v1114_v28 = vmax.f32 %v1082_v44, 0.0 }
 0x129   : > { %v1112_v30 = vmax.f32 %v1080_v25, 0.0 }
 0x12a   : > { %v1136_v32 = vpack.c.bf16 %v1114_v28, %v1113_v38 }
 0x12b   : > { %v1135_v33 = vpack.c.bf16 %v1112_v30, %v1111_v29  ;;  %v2875_v34 = vpop.f32.mrb[20].mxu1 }
 0x12c   : > { %v1085_v35 = vadd.f32 %v2875_v34, %v3558_v22  ;;  %v1016_v36 = vpop.f32.mrb[21].mxu1 }
 0x12d   : > { %v1083_v37 = vadd.f32 %v1016_v36, %v3560_v24  ;;  %v2876_v39 = vpop.f32.mrb[22].mxu1 }
 0x12e   : > { %v1086_v40 = vadd.f32 %v2876_v39, %v3562_v26  ;;  %v1019_v45 = vpop.f32.mrb[23].mxu1  ;;  %v1117_v47 = vmax.f32 %v1085_v35, 0.0 }
 0x12f   : > { %2902 = vmatmul.mubr.msk.bf16.gmra.mrb[16].mxu0 %vm1155_vm4, %v1134_v27  ;;  %v1084_v46 = vadd.f32 %v1019_v45, %v3566_v31  ;;  %v1115_v49 = vmax.f32 %v1083_v37, 0.0 }
 0x130   : > { %2905 = vmatprep.mubr.msk.bf16.mxu0 %vm1155_vm4, %v1135_v33  ;;  %v1118_v48 = vmax.f32 %v1086_v40, 0.0 }
 0x131   : > { %v1116_v50 = vmax.f32 %v1084_v46, 0.0 }
 0x132   : > { %v1138_v51 = vpack.c.bf16 %v1118_v48, %v1117_v47 }
 0x133   : > { %v1137_v52 = vpack.c.bf16 %v1116_v50, %v1115_v49  ;;  %v2879_v53 = vpop.f32.mrb[24].mxu1 }
 0x134   : > { %v1089_v54 = vadd.f32 %v2879_v53, %v3558_v22  ;;  %v1032_v55 = vpop.f32.mrb[25].mxu1 }
 0x135   : > { %v1087_v56 = vadd.f32 %v1032_v55, %v3560_v24  ;;  %v2880_v57 = vpop.f32.mrb[26].mxu1 }
 0x136   : > { %v1090_v58 = vadd.f32 %v2880_v57, %v3562_v26  ;;  %v1035_v59 = vpop.f32.mrb[27].mxu1  ;;  %v1121_v61 = vmax.f32 %v1089_v54, 0.0 }
 0x137   : > { %2906 = vmatmul.mubr.msk.bf16.gmra.mrb[20].mxu0 %vm1155_vm4, %v1136_v32  ;;  %v1088_v60 = vadd.f32 %v1035_v59, %v3566_v31  ;;  %v1119_v63 = vmax.f32 %v1087_v56, 0.0 }
 0x138   : > { %2909 = vmatprep.mubr.msk.bf16.mxu0 %vm1155_vm4, %v1137_v52  ;;  %v1122_v62 = vmax.f32 %v1090_v58, 0.0 }
 0x139   : > { %v1120_v0 = vmax.f32 %v1088_v60, 0.0 }
 0x13a   : > { %v1140_v1 = vpack.c.bf16 %v1122_v62, %v1121_v61 }
 0x13b   : > { %v1139_v2 = vpack.c.bf16 %v1120_v0, %v1119_v63  ;;  %v2883_v3 = vpop.f32.mrb[28].mxu1 }
 0x13c   : > { %v1093_v4 = vadd.f32 %v2883_v3, %v3558_v22  ;;  %v1048_v5 = vpop.f32.mrb[29].mxu1 }
 0x13d   : > { %v1091_v6 = vadd.f32 %v1048_v5, %v3560_v24  ;;  %v2884_v7 = vpop.f32.mrb[30].mxu1 }
 0x13e   : > { %v1094_v8 = vadd.f32 %v2884_v7, %v3562_v26  ;;  %v1051_v9 = vpop.f32.mrb[31].mxu1  ;;  %v1125_v10 = vmax.f32 %v1093_v4, 0.0 }
 0x13f   : > { %2910 = vmatmul.mubr.msk.bf16.gmra.mrb[24].mxu0 %vm1155_vm4, %v1138_v51  ;;  %v1092_v23 = vadd.f32 %v1051_v9, %v3566_v31  ;;  %v1123_v12 = vmax.f32 %v1091_v6, 0.0 }
 0x140   : > { %2913 = vmatprep.mubr.msk.bf16.mxu0 %vm1155_vm4, %v1139_v2  ;;  %v1126_v11 = vmax.f32 %v1094_v8, 0.0 }
 0x141   : > { %v1124_v13 = vmax.f32 %v1092_v23, 0.0 }
 0x142   : > { %v1142_v14 = vpack.c.bf16 %v1126_v11, %v1125_v10 }
 0x143   : > { %v1141_v15 = vpack.c.bf16 %v1124_v13, %v1123_v12  ;;  %v2925_v16 = vpop.f32.mrb[32].mxu1 }
 0x144   : > { %v1943_v17 = vadd.f32 %v2925_v16, %v3558_v22  ;;  %v1814_v27 = vpop.f32.mrb[33].mxu1 }
 0x145   : > { %v1941_v18 = vadd.f32 %v1814_v27, %v3560_v24  ;;  %v2926_v43 = vpop.f32.mrb[34].mxu1 }
 0x146   : > { %v1944_v19 = vadd.f32 %v2926_v43, %v3562_v26  ;;  %v1817_v41 = vpop.f32.mrb[35].mxu1  ;;  %v1975_v21 = vmax.f32 %v1943_v17, 0.0 }
 0x147   : > { %2914 = vmatmul.mubr.msk.bf16.gmra.mrb[28].mxu0 %vm1155_vm4, %v1140_v1  ;;  %v1942_v20 = vadd.f32 %v1817_v41, %v3566_v31  ;;  %v1973_v42 = vmax.f32 %v1941_v18, 0.0 }
 0x148   : > { %2917 = vmatprep.mubr.msk.bf16.mxu0 %vm1155_vm4, %v1141_v15  ;;  %v1976_v44 = vmax.f32 %v1944_v19, 0.0 }
 0x149   : > { %v1974_v25 = vmax.f32 %v1942_v20, 0.0 }
 0x14a   : > { %v2006_v38 = vpack.c.bf16 %v1976_v44, %v1975_v21 }
 0x14b   : > { %v2005_v28 = vpack.c.bf16 %v1974_v25, %v1973_v42  ;;  %v2929_v29 = vpop.f32.mrb[36].mxu1 }
 0x14c   : > { %v1947_v30 = vadd.f32 %v2929_v29, %v3558_v22  ;;  %v1830_v32 = vpop.f32.mrb[37].mxu1 }
 0x14d   : > { %v1945_v33 = vadd.f32 %v1830_v32, %v3560_v24  ;;  %v2930_v34 = vpop.f32.mrb[38].mxu1 }
 0x14e   : > { %v1948_v35 = vadd.f32 %v2930_v34, %v3562_v26  ;;  %v1833_v36 = vpop.f32.mrb[39].mxu1  ;;  %v1979_v39 = vmax.f32 %v1947_v30, 0.0 }
 0x14f   : > { %2918 = vmatmul.mubr.msk.bf16.gmra.mrb[32].mxu0 %vm1155_vm4, %v1142_v14  ;;  %v1946_v37 = vadd.f32 %v1833_v36, %v3566_v31  ;;  %v1977_v45 = vmax.f32 %v1945_v33, 0.0 }
 0x150   : > { %2959 = vmatprep.mubr.msk.bf16.mxu0 %vm1155_vm4, %v2005_v28  ;;  %v1980_v40 = vmax.f32 %v1948_v35, 0.0 }
 0x151   : > { %v1978_v46 = vmax.f32 %v1946_v37, 0.0 }
 0x152   : > { %v2008_v47 = vpack.c.bf16 %v1980_v40, %v1979_v39 }
 0x153   : > { %v2007_v48 = vpack.c.bf16 %v1978_v46, %v1977_v45  ;;  %v2933_v49 = vpop.f32.mrb[40].mxu1 }
 0x154   : > { %v1951_v50 = vadd.f32 %v2933_v49, %v3558_v22  ;;  %v1846_v51 = vpop.f32.mrb[41].mxu1 }
 0x155   : > { %v1949_v52 = vadd.f32 %v1846_v51, %v3560_v24  ;;  %v2934_v53 = vpop.f32.mrb[42].mxu1 }
 0x156   : > { %v1952_v54 = vadd.f32 %v2934_v53, %v3562_v26  ;;  %v1849_v55 = vpop.f32.mrb[43].mxu1  ;;  %v1983_v57 = vmax.f32 %v1951_v50, 0.0 }
 0x157   : > { %2960 = vmatmul.mubr.msk.bf16.vlgmr.msra.gmra.mrb[36].mxu0 %vm1155_vm4, %v2006_v38  ;;  %v1950_v56 = vadd.f32 %v1849_v55, %v3566_v31  ;;  %v1981_v59 = vmax.f32 %v1949_v52, 0.0 }
 0x158   : > { %2963 = vmatprep.mubr.msk.bf16.mxu0 %vm1155_vm4, %v2007_v48  ;;  %v1984_v58 = vmax.f32 %v1952_v54, 0.0 }
 0x159   : > { %v1982_v60 = vmax.f32 %v1950_v56, 0.0 }
 0x15a   : > { %v2010_v61 = vpack.c.bf16 %v1984_v58, %v1983_v57 }
 0x15b   : > { %v2009_v62 = vpack.c.bf16 %v1982_v60, %v1981_v59  ;;  %v2937_v63 = vpop.f32.mrb[44].mxu1 }
 0x15c   : > { %v1955_v0 = vadd.f32 %v2937_v63, %v3558_v22  ;;  %v1862_v1 = vpop.f32.mrb[45].mxu1 }
 0x15d   : > { %v1953_v2 = vadd.f32 %v1862_v1, %v3560_v24  ;;  %v2938_v3 = vpop.f32.mrb[46].mxu1 }
 0x15e   : > { %v1956_v4 = vadd.f32 %v2938_v3, %v3562_v26  ;;  %v1865_v5 = vpop.f32.mrb[47].mxu1  ;;  %v1987_v7 = vmax.f32 %v1955_v0, 0.0 }
 0x15f   : > { %2964 = vmatmul.mubr.msk.bf16.gmra.mrb[40].mxu0 %vm1155_vm4, %v2008_v47  ;;  %v1954_v6 = vadd.f32 %v1865_v5, %v3566_v31  ;;  %v1985_v9 = vmax.f32 %v1953_v2, 0.0 }
 0x160   : > { %2967 = vmatprep.mubr.msk.bf16.mxu0 %vm1155_vm4, %v2009_v62  ;;  %v1988_v8 = vmax.f32 %v1956_v4, 0.0 }
 0x161   : > { %v1986_v23 = vmax.f32 %v1954_v6, 0.0 }
 0x162   : > { %v2012_v10 = vpack.c.bf16 %v1988_v8, %v1987_v7 }
 0x163   : > { %v2011_v11 = vpack.c.bf16 %v1986_v23, %v1985_v9  ;;  %v2941_v12 = vpop.f32.mrb[48].mxu1 }
 0x164   : > { %v1959_v13 = vadd.f32 %v2941_v12, %v3558_v22  ;;  %v1878_v14 = vpop.f32.mrb[49].mxu1 }
 0x165   : > { %v1957_v15 = vadd.f32 %v1878_v14, %v3560_v24  ;;  %v2942_v16 = vpop.f32.mrb[50].mxu1 }
 0x166   : > { %v1960_v17 = vadd.f32 %v2942_v16, %v3562_v26  ;;  %v1881_v27 = vpop.f32.mrb[51].mxu1  ;;  %v1991_v43 = vmax.f32 %v1959_v13, 0.0 }
 0x167   : > { %2968 = vmatmul.mubr.msk.bf16.gmra.mrb[44].mxu0 %vm1155_vm4, %v2010_v61  ;;  %v1958_v18 = vadd.f32 %v1881_v27, %v3566_v31  ;;  %v1989_v41 = vmax.f32 %v1957_v15, 0.0 }
 0x168   : > { %2971 = vmatprep.mubr.msk.bf16.mxu0 %vm1155_vm4, %v2011_v11  ;;  %v1992_v19 = vmax.f32 %v1960_v17, 0.0 }
 0x169   : > { %v1990_v20 = vmax.f32 %v1958_v18, 0.0 }
 0x16a   : > { %v2014_v21 = vpack.c.bf16 %v1992_v19, %v1991_v43 }
 0x16b   : > { %v2013_v44 = vpack.c.bf16 %v1990_v20, %v1989_v41  ;;  %v2945_v42 = vpop.f32.mrb[52].mxu1 }
 0x16c   : > { %v1963_v25 = vadd.f32 %v2945_v42, %v3558_v22  ;;  %v1894_v38 = vpop.f32.mrb[53].mxu1 }
 0x16d   : > { %v1961_v28 = vadd.f32 %v1894_v38, %v3560_v24  ;;  %v2946_v29 = vpop.f32.mrb[54].mxu1 }
 0x16e   : > { %v1964_v30 = vadd.f32 %v2946_v29, %v3562_v26  ;;  %v1897_v32 = vpop.f32.mrb[55].mxu1  ;;  %v1995_v34 = vmax.f32 %v1963_v25, 0.0 }
 0x16f   : > { %2972 = vmatmul.mubr.msk.bf16.gmra.mrb[48].mxu0 %vm1155_vm4, %v2012_v10  ;;  %v1962_v33 = vadd.f32 %v1897_v32, %v3566_v31  ;;  %v1993_v36 = vmax.f32 %v1961_v28, 0.0 }
 0x170   : > { %2975 = vmatprep.mubr.msk.bf16.mxu0 %vm1155_vm4, %v2013_v44  ;;  %v1996_v35 = vmax.f32 %v1964_v30, 0.0 }
 0x171   : > { %v1994_v37 = vmax.f32 %v1962_v33, 0.0 }
 0x172   : > { %v2016_v39 = vpack.c.bf16 %v1996_v35, %v1995_v34 }
 0x173   : > { %v2015_v40 = vpack.c.bf16 %v1994_v37, %v1993_v36  ;;  %v2949_v45 = vpop.f32.mrb[56].mxu1 }
 0x174   : > { %v1967_v46 = vadd.f32 %v2949_v45, %v3558_v22  ;;  %v1910_v47 = vpop.f32.mrb[57].mxu1 }
 0x175   : > { %v1965_v48 = vadd.f32 %v1910_v47, %v3560_v24  ;;  %v2950_v49 = vpop.f32.mrb[58].mxu1 }
 0x176   : > { %v1968_v50 = vadd.f32 %v2950_v49, %v3562_v26  ;;  %v1913_v51 = vpop.f32.mrb[59].mxu1  ;;  %v1999_v53 = vmax.f32 %v1967_v46, 0.0 }
 0x177   : > { %2976 = vmatmul.mubr.msk.bf16.gmra.mrb[52].mxu0 %vm1155_vm4, %v2014_v21  ;;  %v1966_v52 = vadd.f32 %v1913_v51, %v3566_v31  ;;  %v1997_v55 = vmax.f32 %v1965_v48, 0.0 }
 0x178   : > { %2979 = vmatprep.mubr.msk.bf16.mxu0 %vm1155_vm4, %v2015_v40  ;;  %v2000_v54 = vmax.f32 %v1968_v50, 0.0 }
 0x179   : > { %v1998_v56 = vmax.f32 %v1966_v52, 0.0 }
 0x17a   : > { %v2018_v57 = vpack.c.bf16 %v2000_v54, %v1999_v53 }
 0x17b   : > { %v2017_v58 = vpack.c.bf16 %v1998_v56, %v1997_v55  ;;  %v2953_v59 = vpop.f32.mrb[60].mxu1 }
 0x17c   : > { %v1971_v60 = vadd.f32 %v2953_v59, %v3558_v22  ;;  %v1926_v61 = vpop.f32.mrb[61].mxu1  ;;  %v1431_v22 = vpop.permute.xlu0 %1430 }
 0x17d   : > { %v1969_v62 = vadd.f32 %v1926_v61, %v3560_v24  ;;  %v2954_v63 = vpop.f32.mrb[62].mxu1  ;;  %v1437_v24 = vpop.permute.xlu1 %1436  ;;  %vm1525_vm6 = vcmp.eq.s32.totalorder %v1431_v22, 1 }
 0x17e   : > { %v1972_v0 = vadd.f32 %v2954_v63, %v3562_v26  ;;  %v1929_v1 = vpop.f32.mrb[63].mxu1  ;;  %v2003_v3 = vmax.f32 %v1971_v60, 0.0  ;;  %vm1527_vm5 = vcmp.eq.s32.totalorder %v1437_v24, 1 }
 0x17f   : > { %2980 = vmatmul.mubr.msk.bf16.gmra.mrb[56].mxu0 %vm1155_vm4, %v2016_v39  ;;  %v1970_v2 = vadd.f32 %v1929_v1, %v3566_v31  ;;  %v2001_v5 = vmax.f32 %v1969_v62, 0.0 }
 0x180   : > { %2983 = vmatprep.mubr.msk.bf16.mxu0 %vm1155_vm4, %v2017_v58  ;;  %v2004_v4 = vmax.f32 %v1972_v0, 0.0  ;;  %v1434_v26 = vpop.permute.xlu0 %1433 }
 0x181   : > { %v2002_v6 = vmax.f32 %v1970_v2, 0.0  ;;  %v1440_v9 = vpop.permute.xlu1 %1439  ;;  %vm1526_vm1 = vcmp.eq.s32.totalorder %v1434_v26, 1 }
 0x182   : > { %v2020_v7 = vpack.c.bf16 %v2004_v4, %v2003_v3  ;;  %vm1528_vm7 = vcmp.eq.s32.totalorder %v1440_v9, 1 }
 0x183   : > { %v2019_v8 = vpack.c.bf16 %v2002_v6, %v2001_v5 }
 0x184   : > { %v1443_v23 = vpop.permute.xlu0 %1442 }
 0x185   : > { %v1446_v10 = vpop.permute.xlu1 %1445  ;;  %vm1529_vm9 = vcmp.eq.s32.totalorder %v1443_v23, 1 }
 0x186   : > { %vm1530_vm11 = vcmp.eq.s32.totalorder %v1446_v10, 1 }
 0x187   : > { %2984 = vmatmul.mubr.msk.bf16.gmra.mrb[60].mxu0 %vm1155_vm4, %v2018_v57 }
 0x188   : > { %2987 = vmatprep.mubr.msk.bf16.mxu0 %vm1155_vm4, %v2019_v8  ;;  %v1449_v11 = vpop.permute.xlu0 %1448 }
 0x189   : > { %v1452_v31 = vpop.permute.xlu1 %1451  ;;  %vm1531_vm8 = vcmp.eq.s32.totalorder %v1449_v11, 1 }
 0x18a   : > { %vm1532_vm10 = vcmp.eq.s32.totalorder %v1452_v31, 1 }
 0x18c   : > { %v1455_v12 = vpop.permute.xlu0 %1454 }
 0x18d   : > { %v3665_v13 = vpop.permute.xlu1 %1457  ;;  %vm1533_vm13 = vcmp.eq.s32.totalorder %v1455_v12, 1 }
 0x18e   : > { %vm1534_vm15 = vcmp.eq.s32.totalorder %v3665_v13, 1 }
 0x18f   : > { %2988 = vmatmul.mubr.msk.bf16.gmra.mrb[64].mxu0 %vm1155_vm4, %v2020_v7 }
 0x190   : > { %v1461_v14 = vpop.permute.xlu0 %1460 }
 0x191   : > { %v1464_v15 = vpop.permute.xlu1 %1463  ;;  %vm1535_vm12 = vcmp.eq.s32.totalorder %v1461_v14, 1 }
 0x192   : > { %vm1536_vm14 = vcmp.eq.s32.totalorder %v1464_v15, 1 }
 0x194   : > { %v3667_v16 = vpop.permute.xlu0 %1466 }
 0x195   : > { %v3669_v17 = vpop.permute.xlu1 %1469  ;;  %vm1537_vm2 = vcmp.eq.s32.totalorder %v3667_v16, 1 }
 0x196   : > { %vm1538_vm4 = vcmp.eq.s32.totalorder %v3669_v17, 1 }
 0x198   : > { %v3671_v27 = vpop.permute.xlu0 %1472 }
 0x199   : > { %v3673_v18 = vpop.permute.xlu1 %1475  ;;  %vm1539_vm0 = vcmp.eq.s32.totalorder %v3671_v27, 1 }
 0x19a   : > { %vm1540_vm3 = vcmp.eq.s32.totalorder %v3673_v18, 1 }
 0x19c   : > { %v3675_v43 = vpop.permute.xlu0 %1478 }
 0x19d   : > { %v3677_v19 = vpop.permute.xlu1 %1481 }
 0x1a0   : > { %v3679_v41 = vpop.permute.xlu0 %1484 }
 0x1a1   : > { %v3681_v20 = vpop.permute.xlu1 %1487 }
 0x1a4   : > { %v3683_v21 = vpop.permute.xlu0 %1490 }
 0x1a5   : > { %v3685_v44 = vpop.permute.xlu1 %1493 }
 0x1a8   : > { %v3687_v42 = vpop.permute.xlu0 %1496 }
 0x1a9   : > { %v3689_v25 = vpop.permute.xlu1 %1499 }
 0x1ac   : > { %v3691_v33 = vpop.permute.xlu0 %1502 }
 0x1ad   : > { %v3693_v37 = vpop.permute.xlu1 %1505 }
 0x1b0   : > { %v3695_v40 = vpop.permute.xlu0 %1508 }
 0x1b1   : > { %v3697_v50 = vpop.permute.xlu1 %1511 }
 0x1b4   : > { %v3699_v57 = vpop.permute.xlu0 %1514 }
 0x1b5   : > { %v3701_v59 = vpop.permute.xlu1 %1517 }
 0x1b8   : > { %v3704_v6 = vpop.permute.xlu0 %1520 }
 0x1b9   : > { %v3706_v8 = vpop.permute.xlu1 %1523 }
 0x1bc   : > { %v3712_v11 = vpop.permute.xlu0 %2295 }
 0x1bd   : > { %v3714_v27 = vpop.permute.xlu1 %2298 }
 0x1c0   : > { %v3718_v18 = vpop.permute.xlu0 %2301 }
 0x1ea   : > { %v2891_v38 = vpop.f32.mrb[4].mxu0 }
 0x1eb   : > { %v1559_v28 = vsel %vm1527_vm5, %v2891_v38, -inf  ;;  %v1238_v29 = vpop.f32.mrb[5].mxu0  ;;  %vm1543_vm5 = vcmp.eq.s32.totalorder %v3679_v41, 1 }
 0x1ec   : > { %v1557_v30 = vsel %vm1525_vm6, %v1238_v29, -inf  ;;  %v2892_v32 = vpop.f32.mrb[6].mxu0  ;;  %vm1541_vm6 = vcmp.eq.s32.totalorder %v3675_v43, 1  ;;  %v3724_v43 = vpop.permute.xlu0 %2307 }
 0x1ed   : > { %v1560_v34 = vsel %vm1528_vm7, %v2892_v32, -inf  ;;  %v1241_v35 = vpop.f32.mrb[7].mxu0  ;;  %vm1544_vm7 = vcmp.eq.s32.totalorder %v3681_v20, 1 }
 0x1ee   : > { %v1558_v36 = vsel %vm1526_vm1, %v1241_v35, -inf  ;;  %vm1542_vm1 = vcmp.eq.s32.totalorder %v3677_v19, 1 }
 0x1f2   : > { %v2895_v39 = vpop.f32.mrb[8].mxu0 }
 0x1f3   : > { %v1563_v45 = vsel %vm1531_vm8, %v2895_v39, -inf  ;;  %v1254_v46 = vpop.f32.mrb[9].mxu0  ;;  %vm1547_vm8 = vcmp.eq.s32.totalorder %v3687_v42, 1  ;;  %v2314_v42 = vpop.permute.xlu0 %2313 }
 0x1f4   : > { %v1603_v47 = vmax.f32 %v1559_v28, %v1563_v45  ;;  %v1561_v48 = vsel %vm1529_vm9, %v1254_v46, -inf  ;;  %v2896_v49 = vpop.f32.mrb[10].mxu0  ;;  %vm1545_vm9 = vcmp.eq.s32.totalorder %v3683_v21, 1 }
 0x1f5   : > { %v1589_v51 = vmax.f32 %v1557_v30, %v1561_v48  ;;  %v1564_v52 = vsel %vm1532_vm10, %v2896_v49, -inf  ;;  %v1257_v53 = vpop.f32.mrb[11].mxu0  ;;  %vm1548_vm10 = vcmp.eq.s32.totalorder %v3689_v25, 1 }
 0x1f6   : > { %v1610_v54 = vmax.f32 %v1560_v34, %v1564_v52  ;;  %v1562_v55 = vsel %vm1530_vm11, %v1257_v53, -inf  ;;  %v3722_v34 = vpop.permute.xlu1 %2304  ;;  %vm1546_vm11 = vcmp.eq.s32.totalorder %v3685_v44, 1 }
 0x1f7   : > { %v1596_v56 = vmax.f32 %v1558_v36, %v1562_v55 }
 0x1fa   : > { %v2899_v58 = vpop.f32.mrb[12].mxu0  ;;  %v3728_v20 = vpop.permute.xlu1 %2310 }
 0x1fb   : > { %v1567_v60 = vsel %vm1535_vm12, %v2899_v58, -inf  ;;  %v1270_v61 = vpop.f32.mrb[13].mxu0  ;;  %vm1551_vm12 = vcmp.eq.s32.totalorder %v3695_v40, 1 }
 0x1fc   : > { %v1604_v62 = vmax.f32 %v1603_v47, %v1567_v60  ;;  %v1565_v63 = vsel %vm1533_vm13, %v1270_v61, -inf  ;;  %v2900_v0 = vpop.f32.mrb[14].mxu0  ;;  %vm1549_vm13 = vcmp.eq.s32.totalorder %v3691_v33, 1 }
 0x1fd   : > { %v1590_v1 = vmax.f32 %v1589_v51, %v1565_v63  ;;  %v1568_v2 = vsel %vm1536_vm14, %v2900_v0, -inf  ;;  %v1273_v3 = vpop.f32.mrb[15].mxu0  ;;  %vm1552_vm14 = vcmp.eq.s32.totalorder %v3697_v50, 1 }
 0x1fe   : > { %v1611_v4 = vmax.f32 %v1610_v54, %v1568_v2  ;;  %v1566_v5 = vsel %vm1534_vm15, %v1273_v3, -inf  ;;  %v3732_v61 = vpop.permute.xlu1 %2316  ;;  %vm1550_vm15 = vcmp.eq.s32.totalorder %v3693_v37, 1 }
 0x1ff   : > { %v1597_v7 = vmax.f32 %v1596_v56, %v1566_v5 }
 0x202   : > { %v2903_v22 = vpop.f32.mrb[16].mxu0  ;;  %v3746_v33 = vpop.permute.xlu1 %2322 }
 0x203   : > { %v1571_v24 = vsel %vm1539_vm0, %v2903_v22, -inf  ;;  %v1286_v26 = vpop.f32.mrb[17].mxu0  ;;  %vm1555_vm0 = vcmp.eq.s32.totalorder %v3704_v6, 1 }
 0x204   : > { %v1605_v9 = vmax.f32 %v1604_v62, %v1571_v24  ;;  %v1569_v23 = vsel %vm1537_vm2, %v1286_v26, -inf  ;;  %v2904_v10 = vpop.f32.mrb[18].mxu0  ;;  %vm1553_vm2 = vcmp.eq.s32.totalorder %v3699_v57, 1 }
 0x205   : > { %v1591_v31 = vmax.f32 %v1590_v1, %v1569_v23  ;;  %v1572_v12 = vsel %vm1540_vm3, %v2904_v10, -inf  ;;  %v1289_v13 = vpop.f32.mrb[19].mxu0  ;;  %v3740_v1 = vpop.permute.xlu0 %2319  ;;  %vm1556_vm3 = vcmp.eq.s32.totalorder %v3706_v8, 1 }
 0x206   : > { %v1612_v14 = vmax.f32 %v1611_v4, %v1572_v12  ;;  %v1570_v15 = vsel %vm1538_vm4, %v1289_v13, -inf  ;;  %vm1554_vm4 = vcmp.eq.s32.totalorder %v3701_v59, 1  ;;  %v2329_v10 = vpop.permute.xlu1 %2328 }
 0x207   : > { %v1598_v38 = vmax.f32 %v1597_v7, %v1570_v15 }
 0x209   : > { %v2326_v22 = vpop.permute.xlu0 %2325 }
 0x20a   : > { %v2907_v16 = vpop.f32.mrb[20].mxu0 }
 0x20b   : > { %v1575_v28 = vsel %vm1543_vm5, %v2907_v16, -inf  ;;  %v1302_v29 = vpop.f32.mrb[21].mxu0  ;;  %vm2391_vm5 = vcmp.eq.s32.totalorder %v3714_v27, 1 }
 0x20c   : > { %v1606_v17 = vmax.f32 %v1605_v9, %v1575_v28  ;;  %v1573_v30 = vsel %vm1541_vm6, %v1302_v29, -inf  ;;  %v2908_v32 = vpop.f32.mrb[22].mxu0  ;;  %vm2390_vm6 = vcmp.eq.s32.totalorder %v3712_v11, 1 }
 0x20d   : > { %v1592_v35 = vmax.f32 %v1591_v31, %v1573_v30  ;;  %v1576_v36 = vsel %vm1544_vm7, %v2908_v32, -inf  ;;  %v1305_v39 = vpop.f32.mrb[23].mxu0  ;;  %vm2392_vm7 = vcmp.eq.s32.totalorder %v3718_v18, 1 }
 0x20e   : > { %v1613_v41 = vmax.f32 %v1612_v14, %v1576_v36  ;;  %v1574_v45 = vsel %vm1542_vm1, %v1305_v39, -inf  ;;  %v2332_v14 = vpop.permute.xlu0 %2331  ;;  %vm2396_vm1 = vcmp.eq.s32.totalorder %v2314_v42, 1 }
 0x20f   : > { %v1599_v46 = vmax.f32 %v1598_v38, %v1574_v45  ;;  %v3770_v38 = vpop.permute.xlu1 %2334 }
 0x212   : > { %v2911_v47 = vpop.f32.mrb[24].mxu0  ;;  %v2338_v29 = vpop.permute.xlu0 %2337 }
 0x213   : > { %v1579_v48 = vsel %vm1547_vm8, %v2911_v47, -inf  ;;  %v1318_v49 = vpop.f32.mrb[25].mxu0  ;;  %vm2393_vm8 = vcmp.eq.s32.totalorder %v3722_v34, 1 }
 0x214   : > { %v1607_v19 = vmax.f32 %v1606_v17, %v1579_v48  ;;  %v1577_v51 = vsel %vm1545_vm9, %v1318_v49, -inf  ;;  %v2912_v52 = vpop.f32.mrb[26].mxu0  ;;  %v2341_v17 = vpop.permute.xlu1 %2340  ;;  %vm2394_vm9 = vcmp.eq.s32.totalorder %v3724_v43, 1 }
 0x215   : > { %v1593_v53 = vmax.f32 %v1592_v35, %v1577_v51  ;;  %v1580_v54 = vsel %vm1548_vm10, %v2912_v52, -inf  ;;  %v1321_v55 = vpop.f32.mrb[27].mxu0  ;;  %vm2397_vm10 = vcmp.eq.s32.totalorder %v3732_v61, 1 }
 0x216   : > { %v1614_v56 = vmax.f32 %v1613_v41, %v1580_v54  ;;  %v1578_v58 = vsel %vm1546_vm11, %v1321_v55, -inf  ;;  %vm2395_vm11 = vcmp.eq.s32.totalorder %v3728_v20, 1  ;;  %v2344_v11 = vpop.permute.xlu0 %2343 }
 0x217   : > { %v1600_v60 = vmax.f32 %v1599_v46, %v1578_v58 }
 0x218   : > { %v2347_v51 = vpop.permute.xlu1 %2346 }
 0x21a   : > { %v2915_v21 = vpop.f32.mrb[28].mxu0  ;;  %v2350_v54 = vpop.permute.xlu0 %2349 }
 0x21b   : > { %v1583_v25 = vsel %vm1551_vm12, %v2915_v21, -inf  ;;  %v1334_v62 = vpop.f32.mrb[29].mxu0  ;;  %vm2400_vm12 = vcmp.eq.s32.totalorder %v2326_v22, 1 }
 0x21c   : > { %v3737_v63 = vmax.f32 %v1607_v19, %v1583_v25  ;;  %v1581_v44 = vsel %vm1549_vm13, %v1334_v62, -inf  ;;  %v2916_v0 = vpop.f32.mrb[30].mxu0  ;;  %vm2398_vm13 = vcmp.eq.s32.totalorder %v3740_v1, 1 }
 0x21d   : > { %v3742_v2 = vmax.f32 %v1593_v53, %v1581_v44  ;;  %v1584_v3 = vsel %vm1552_vm14, %v2916_v0, -inf  ;;  %v1337_v4 = vpop.f32.mrb[31].mxu0  ;;  %vm2401_vm14 = vcmp.eq.s32.totalorder %v2329_v10, 1 }
 0x21e   : > { %v3744_v40 = vmax.f32 %v1614_v56, %v1584_v3  ;;  %v1582_v5 = vsel %vm1550_vm15, %v1337_v4, -inf  ;;  %vm2399_vm15 = vcmp.eq.s32.totalorder %v3746_v33, 1  ;;  %v2356_v0 = vpop.permute.xlu0 %2355 }
 0x21f   : > { %v3748_v7 = vmax.f32 %v1600_v60, %v1582_v5  ;;  %v2353_v60 = vpop.permute.xlu1 %2352 }
 0x222   : > { %v2919_v50 = vpop.f32.mrb[32].mxu0 }
 0x223   : > { %v3752_v37 = vsel %vm1555_vm0, %v2919_v50, -inf  ;;  %v1350_v24 = vpop.f32.mrb[33].mxu0  ;;  %vm2404_vm0 = vcmp.eq.s32.totalorder %v2338_v29, 1  ;;  %v2359_v1 = vpop.permute.xlu1 %2358 }
 0x224   : > { %v1609_v26 = vmax.f32 %v3737_v63, %v3752_v37  ;;  %v3757_v9 = vsel %vm1553_vm2, %v1350_v24, -inf  ;;  %v2920_v23 = vpop.f32.mrb[34].mxu0  ;;  %vm2402_vm2 = vcmp.eq.s32.totalorder %v2332_v14, 1 }
 0x225   : > { %v1595_v6 = vmax.f32 %v3742_v2, %v3757_v9  ;;  %v3762_v31 = vsel %vm1556_vm3, %v2920_v23, -inf  ;;  %v1353_v57 = vpop.f32.mrb[35].mxu0  ;;  %vm2405_vm3 = vcmp.eq.s32.totalorder %v2341_v17, 1 }
 0x226   : > { %v1616_v12 = vmax.f32 %v3744_v40, %v3762_v31  ;;  %v3766_v13 = vsel %vm1554_vm4, %v1353_v57, -inf  ;;  %vm2403_vm4 = vcmp.eq.s32.totalorder %v3770_v38, 1 }
 0x227   : > { %v1602_v8 = vmax.f32 %v3748_v7, %v3766_v13 }
 0x22a   : > { %v2961_v15 = vpop.f32.mrb[36].mxu0 }
 0x22b   : > { %v2103_v59 = vpop.f32.mrb[37].mxu0  ;;  %v2424_v32 = vsel %vm2392_vm7, %v2961_v15, -inf  ;;  %vm2409_vm7 = vcmp.eq.s32.totalorder %v2353_v60, 1 }
 0x22c   : > { %v2962_v16 = vpop.f32.mrb[38].mxu0  ;;  %v2422_v39 = vsel %vm2390_vm6, %v2103_v59, -inf  ;;  %v2362_v59 = vpop.permute.xlu0 %2361  ;;  %vm2406_vm6 = vcmp.eq.s32.totalorder %v2344_v11, 1 }
 0x22d   : > { %v2106_v28 = vpop.f32.mrb[39].mxu0  ;;  %v2425_v47 = vsel %vm2393_vm8, %v2962_v16, -inf  ;;  %vm2412_vm8 = vcmp.eq.s32.totalorder %v2362_v59, 1 }
 0x22e   : > { %v2423_v34 = vsel %vm2391_vm5, %v2106_v28, -inf  ;;  %v2365_v28 = vpop.permute.xlu1 %2364  ;;  %vm2408_vm5 = vcmp.eq.s32.totalorder %v2350_v54, 1 }
 0x232   : > { %v2965_v30 = vpop.f32.mrb[40].mxu0 }
 0x233   : > { %v2428_v35 = vsel %vm2396_vm1, %v2965_v30, -inf  ;;  %v2119_v36 = vpop.f32.mrb[41].mxu0  ;;  %vm2407_vm1 = vcmp.eq.s32.totalorder %v2347_v51, 1 }
 0x234   : > { %v2468_v41 = vmax.f32 %v2424_v32, %v2428_v35  ;;  %v2426_v45 = vsel %vm2394_vm9, %v2119_v36, -inf  ;;  %v2966_v46 = vpop.f32.mrb[42].mxu0  ;;  %v2368_v36 = vpop.permute.xlu0 %2367  ;;  %vm2410_vm9 = vcmp.eq.s32.totalorder %v2356_v0, 1 }
 0x235   : > { %v2454_v18 = vmax.f32 %v2422_v39, %v2426_v45  ;;  %v2429_v48 = vsel %vm2397_vm10, %v2966_v46, -inf  ;;  %v2122_v49 = vpop.f32.mrb[43].mxu0  ;;  %vm2413_vm10 = vcmp.eq.s32.totalorder %v2365_v28, 1 }
 0x236   : > { %v2475_v43 = vmax.f32 %v2425_v47, %v2429_v48  ;;  %v2427_v19 = vsel %vm2395_vm11, %v2122_v49, -inf  ;;  %v2371_v47 = vpop.permute.xlu1 %2370  ;;  %vm2411_vm11 = vcmp.eq.s32.totalorder %v2359_v1, 1 }
 0x237   : > { %v2461_v52 = vmax.f32 %v2423_v34, %v2427_v19 }
 0x238   : > { %v2374_v49 = vpop.permute.xlu0 %2373 }
 0x23a   : > { %v2969_v53 = vpop.f32.mrb[44].mxu0  ;;  %v2377_v51 = vpop.permute.xlu1 %2376 }
 0x23b   : > { %v2432_v55 = vsel %vm2400_vm12, %v2969_v53, -inf  ;;  %v2135_v56 = vpop.f32.mrb[45].mxu0  ;;  %vm2416_vm12 = vcmp.eq.s32.totalorder %v2374_v49, 1 }
 0x23c   : > { %v2469_v20 = vmax.f32 %v2468_v41, %v2432_v55  ;;  %v2430_v58 = vsel %vm2398_vm13, %v2135_v56, -inf  ;;  %v2970_v42 = vpop.f32.mrb[46].mxu0  ;;  %vm2414_vm13 = vcmp.eq.s32.totalorder %v2368_v36, 1 }
 0x23d   : > { %v2455_v27 = vmax.f32 %v2454_v18, %v2430_v58  ;;  %v2433_v61 = vsel %vm2401_vm14, %v2970_v42, -inf  ;;  %v2138_v21 = vpop.f32.mrb[47].mxu0  ;;  %v2380_v42 = vpop.permute.xlu0 %2379  ;;  %vm2417_vm14 = vcmp.eq.s32.totalorder %v2377_v51, 1 }
 0x23e   : > { %v2476_v25 = vmax.f32 %v2475_v43, %v2433_v61  ;;  %v2431_v62 = vsel %vm2399_vm15, %v2138_v21, -inf  ;;  %vm2415_vm15 = vcmp.eq.s32.totalorder %v2371_v47, 1 }
 0x23f   : > { %v2462_v44 = vmax.f32 %v2461_v52, %v2431_v62 }
 0x242   : > { %v2973_v3 = vpop.f32.mrb[48].mxu0 }
 0x243   : > { %v2436_v4 = vsel %vm2404_vm0, %v2973_v3, -inf  ;;  %v2151_v5 = vpop.f32.mrb[49].mxu0 }
 0x244   : > { %v2470_v50 = vmax.f32 %v2469_v20, %v2436_v4  ;;  %v2434_v22 = vsel %vm2402_vm2, %v2151_v5, -inf  ;;  %v2974_v24 = vpop.f32.mrb[50].mxu0  ;;  %vm2418_vm2 = vcmp.eq.s32.totalorder %v2380_v42, 1 }
 0x245   : > { %v2456_v33 = vmax.f32 %v2455_v27, %v2434_v22  ;;  %v2437_v23 = vsel %vm2405_vm3, %v2974_v24, -inf  ;;  %v2154_v10 = vpop.f32.mrb[51].mxu0  ;;  %v2383_v27 = vpop.permute.xlu1 %2382 }
 0x246   : > { %v2477_v57 = vmax.f32 %v2476_v25, %v2437_v23  ;;  %v2435_v15 = vsel %vm2403_vm4, %v2154_v10, -inf  ;;  %vm2419_vm4 = vcmp.eq.s32.totalorder %v2383_v27, 1 }
 0x247   : > { %v2463_v16 = vmax.f32 %v2462_v44, %v2435_v15 }
 0x249   : > { %v2389_v24 = vpop.permute.xlu1 %2388 }
 0x24a   : > { %v2977_v29 = vpop.f32.mrb[52].mxu0  ;;  %vm2421_vm3 = vcmp.eq.s32.totalorder %v2389_v24, 1 }
 0x24b   : > { %v2440_v14 = vsel %vm2408_vm5, %v2977_v29, -inf  ;;  %v2167_v30 = vpop.f32.mrb[53].mxu0 }
 0x24c   : > { %v2471_v17 = vmax.f32 %v2470_v50, %v2440_v14  ;;  %v2438_v32 = vsel %vm2406_vm6, %v2167_v30, -inf  ;;  %v2978_v35 = vpop.f32.mrb[54].mxu0  ;;  %v2386_v50 = vpop.permute.xlu0 %2385 }
 0x24d   : > { %v2457_v38 = vmax.f32 %v2456_v33, %v2438_v32  ;;  %v2441_v39 = vsel %vm2409_vm7, %v2978_v35, -inf  ;;  %v2170_v41 = vpop.f32.mrb[55].mxu0  ;;  %vm2420_vm0 = vcmp.eq.s32.totalorder %v2386_v50, 1 }
 0x24e   : > { %v2478_v45 = vmax.f32 %v2477_v57, %v2441_v39  ;;  %v2439_v46 = vsel %vm2407_vm1, %v2170_v41, -inf }
 0x24f   : > { %v2464_v18 = vmax.f32 %v2463_v16, %v2439_v46  ;;  %v2764_v16 = vld [vmem:[%s3857_s7] ss:$0 sm:$0xff] }
 0x252   : > { %v2981_v48 = vpop.f32.mrb[56].mxu0 }
 0x253   : > { %v2444_v11 = vsel %vm2412_vm8, %v2981_v48, -inf  ;;  %v2183_v34 = vpop.f32.mrb[57].mxu0 }
 0x254   : > { %v2472_v43 = vmax.f32 %v2471_v17, %v2444_v11  ;;  %v2442_v19 = vsel %vm2410_vm9, %v2183_v34, -inf  ;;  %v2982_v52 = vpop.f32.mrb[58].mxu0 }
 0x255   : > { %v2458_v53 = vmax.f32 %v2457_v38, %v2442_v19  ;;  %v2445_v54 = vsel %vm2413_vm10, %v2982_v52, -inf  ;;  %v2186_v55 = vpop.f32.mrb[59].mxu0 }
 0x256   : > { %v2479_v56 = vmax.f32 %v2478_v45, %v2445_v54  ;;  %v2443_v20 = vsel %vm2411_vm11, %v2186_v55, -inf }
 0x257   : > { %v2465_v58 = vmax.f32 %v2464_v18, %v2443_v20 }
 0x25a   : > { %v2985_v60 = vpop.f32.mrb[60].mxu0 }
 0x25b   : > { %v2448_v61 = vsel %vm2416_vm12, %v2985_v60, -inf  ;;  %v2199_v21 = vpop.f32.mrb[61].mxu0 }
 0x25c   : > { %v2473_v25 = vmax.f32 %v2472_v43, %v2448_v61  ;;  %v2446_v62 = vsel %vm2414_vm13, %v2199_v21, -inf  ;;  %v2986_v44 = vpop.f32.mrb[62].mxu0 }
 0x25d   : > { %v2459_v0 = vmax.f32 %v2458_v53, %v2446_v62  ;;  %v2449_v3 = vsel %vm2417_vm14, %v2986_v44, -inf  ;;  %v2202_v1 = vpop.f32.mrb[63].mxu0 }
 0x25e   : > { %v2480_v4 = vmax.f32 %v2479_v56, %v2449_v3  ;;  %v2447_v5 = vsel %vm2415_vm15, %v2202_v1, -inf }
 0x25f   : > { %v2466_v22 = vmax.f32 %v2465_v58, %v2447_v5 }
 0x262   : > { %v2989_v33 = vpop.f32.mrb[64].mxu0 }
 0x263   : > { %v2452_v23 = vsel %vm2420_vm0, %v2989_v33, -inf  ;;  %v2215_v10 = vpop.f32.mrb[65].mxu0 }
 0x264   : > { %v2474_v57 = vmax.f32 %v2473_v25, %v2452_v23  ;;  %v2450_v15 = vsel %vm2418_vm2, %v2215_v10, -inf  ;;  %v2990_v59 = vpop.f32.mrb[66].mxu0 }
 0x265   : > { %v2460_v28 = vmax.f32 %v2459_v0, %v2450_v15  ;;  %v2453_v29 = vsel %vm2421_vm3, %v2990_v59, -inf  ;;  %v2218_v14 = vpop.f32.mrb[67].mxu0 }
 0x266   : > { %v2484_v30 = vmax.f32 %v1609_v26, %v2474_v57  ;;  %v2481_v17 = vmax.f32 %v2480_v4, %v2453_v29  ;;  %v2451_v32 = vsel %vm2419_vm4, %v2218_v14, -inf }
 0x267   : > { %v2482_v35 = vmax.f32 %v1595_v6, %v2460_v28  ;;  %v2467_v36 = vmax.f32 %v2466_v22, %v2451_v32 }
 0x268   : > { %vm2488_vm5 = vcmp.gt.f32.partialorder %v2484_v30, -inf  ;;  %v2499_v38 = vadd.f32 %v2764_v16, %v2484_v30  ;;  %v2485_v39 = vmax.f32 %v1616_v12, %v2481_v17 }
 0x269   : > { %vm2486_vm6 = vcmp.gt.f32.partialorder %v2482_v35, -inf  ;;  %v2497_v41 = vadd.f32 %v2764_v16, %v2482_v35  ;;  %v2483_v63 = vmax.f32 %v1602_v8, %v2467_v36 }
 0x26a   : > { %v2503_v37 = vsel %vm2488_vm5, %v2499_v38, 0.0  ;;  %vm2489_vm7 = vcmp.gt.f32.partialorder %v2485_v39, -inf  ;;  %v2500_v2 = vadd.f32 %v2764_v16, %v2485_v39 }
 0x26b   : > { %2507 = vst [vmem:[%s629_s25 + $0x10] sm:$0xff] %v2503_v37  ;;  %v2501_v26 = vsel %vm2486_vm6, %v2497_v41, 0.0  ;;  %vm2487_vm1 = vcmp.gt.f32.partialorder %v2483_v63, -inf  ;;  %v2498_v9 = vadd.f32 %v2764_v16, %v2483_v63 }
 0x26c   : > { %2505 = vst [vmem:[%s629_s25] sm:$0xff] %v2501_v26  ;;  %v2504_v40 = vsel %vm2489_vm7, %v2500_v2, 0.0 }
 0x26d   : > { %2508 = vst [vmem:[%s629_s25 + $0x18] sm:$0xff] %v2504_v40  ;;  %v2502_v7 = vsel %vm2487_vm1, %v2498_v9, 0.0 }
 0x26e   : > { %2506 = vst [vmem:[%s629_s25 + $0x8] sm:$0xff] %v2502_v7 }
 0x26f   : > { %3087 = shalt.err (!%p3084_p7)
}
 0x270   : > { %s3088_s22 = scalar_lea.hbm %s3804_s9, 512  ;;  %s3092_s25 = scalar_lea.hbm %s3858_s8, 1024 }
 0x271   : > { %p3089_p10 = scmp.ne.s32.totalorder %s3804_s9, %s3088_s22  ;;  %p3093_p13 = scmp.lt.u32.totalorder %s3804_s9, %s3858_s8 }
 0x272   : > { %p3094_p0 = scmp.lt.u32.totalorder %s3092_s25, %s3088_s22  ;;  %p3096_p2 = scmp.lt.u32.totalorder %s3088_s22, %s3804_s9 }
 0x273   : > { %p3090_p11 = pnand %p3089_p10, %p3226_p6 }
 0x274   : > { %p3095_p1 = por %p3094_p0, %p3093_p13 }
 0x275   : > { %p3091_p12 = pneg %p3090_p11 }
 0x276   : > { %p3097_p3 = por %p3096_p2, %p3095_p1 }
 0x278   : > { %p3098_p4 = pnand %p3097_p3, %p3091_p12 }
 0x27a   : > { %3101 = shalt.err (!%p3098_p4)
}
 0x27b   : > { %s3140_s19 = smov 128   ;;  %s3141_s18 = smov 8  }
 0x27c   : > { %2994 = dma.vmem_to_hbm [thread:$0]  (%p3226_p6), %s3806_s12, 512, %s3804_s9, %s2510_s17, %s3140_s19, %s3140_s19, %s3141_s18  }
 0x27d PF: > { %s2538_s20 = sand.u32 1, %s3124_s27   ;;  %p2997_p5 = pnand %p2618_p9, %p3230_p8 }
 0x27e   : > { %s2539_s21 = scalar_lea.sflag [#allocation4], %s2538_s20 }
 0x27f   : > { %3119 = dma.done.wait (!%p2997_p5), %s2539_s21, 512  }
 0x280   : > { %3121 = vsyncadd (!%p2997_p5), %s2539_s21, 4294966784  ;;  %p18_p7 = scmp.ge.s32.totalorder %s3212_s11, 4   ;;  %s3861_s27 = smov %s3128_s28 }
 0x281   : > { %s3862_s28 = smov %s3132_s29  ;;  %s3863_s29 = smov %s3224_s14 }
 0x282   : > { %s3864_s30 = smov %s3212_s11  ;;  %20 = sbr.rel (!%p18_p7) target bundleno = 3 (0x3), region = 141 }
 0x289   :  { %2544 = vsyncpa [#allocation4], 1 }
 0x28a   :  { %2546 = vsyncpa [#allocation4 + $0x1], 1 }

</bundles_post_ra>
